<compile_context>
chip_gen: v7x
topology: tpu7x:2x2x1
jax: 0.10.0
libtpu: 0.0.40
codegen_flags: <defaults>
</compile_context>

<pallas_src>
import functools

import numpy as np

import jax
import jax.numpy as jnp
from jax import lax
from jax.experimental import pallas as pl
from jax.experimental.pallas import tpu as pltpu

LN_EPS = 1e-5
_R = 80          # 77 channel rows padded to 80 (multiple of 8 sublanes and of the
                 # bf16 16-row packing), so every in-kernel slice is tile-aligned.


def _round_up(n, m):
    return (n + m - 1) // m * m


# --------------------------------------------------------------------------- kernel
def _fmri_kernel(x_ref, wch_ref, wdim_ref, wconv_ref, bias_ref, out_ref, clip_ref):
    """Fused forward for a block of `bt` batch elements.

    x_ref    : (bt, S, L)    f32 (cast to compute dtype in-kernel)
    wch_ref  : (2R, S)       rows [0:77]  = cm_w2@cm_w1, rows [R:R+77] = ec_w2@ec_w1
    wdim_ref : (2Lp, D)      rows [0:L]   = dm_w.T,      rows [Lp:Lp+L] = ec_lw.T
    wconv_ref: (3R, R)       rows/cols >= 77 zero; tap k at rows [kR : kR+77]
    bias_ref : (3R+8, D) f32 [0:R]=B_clip, [R:2R]=B_e4, [2R:3R]=co_b broadcast,
                             rows 3R..3R+3 = ln_g, ln_b, ec_ln_g, ec_ln_b
    out_ref, clip_ref : (bt, 77, D) in the output dtype (bf16 by default)
    """
    f32 = jnp.float32
    bt, _s, L = x_ref.shape
    D = out_ref.shape[2]
    Lp = wdim_ref.shape[0] // 2
    cdt = wch_ref.dtype

    # Hoisted, lane-dense parameter loads (one per slab, loop-invariant).
    wch = wch_ref[...]
    wd = wdim_ref[...]
    wcv = wconv_ref[...]
    bias = bias_ref[...]

    wd_c = wd[0:L]
    wd_e = wd[Lp:Lp + L]
    b_clip = bias[0:_R]                      # pad rows 77..79 are zero
    b_e4 = bias[_R:2 * _R]
    co_b = bias[2 * _R:3 * _R]
    g1 = bias[3 * _R + 0:3 * _R + 1]
    t1 = bias[3 * _R + 1:3 * _R + 2]
    g2 = bias[3 * _R + 2:3 * _R + 3]
    t2 = bias[3 * _R + 3:3 * _R + 4]

    # Conv edge masks, hoisted out of the batch loop.
    col = lax.broadcasted_iota(jnp.int32, (_R, D), 1)
    mask_l = col == 0
    mask_r = col == D - 1

    inv_d = 1.0 / D

    def layer_norm(y, gamma, beta):
        # two-pass statistics in f32 (numerically safer than E[y^2] - mu^2)
        mu = jnp.sum(y, axis=-1, keepdims=True) * inv_d
        d = y - mu
        var = jnp.sum(d * d, axis=-1, keepdims=True) * inv_d
        return d * lax.rsqrt(var + LN_EPS) * gamma + beta

    def body(i, carry):
        xb = x_ref[i].astype(cdt)                                        # (S, L)

        # Both branches' fused (k=1 o k=1) channel convs in one MXU pass (M = 2R).
        h = jnp.dot(wch, xb, preferred_element_type=f32).astype(cdt)     # (2R, L)

        # dim_mapper / extra_clip Linear over the latent axis; biases pre-folded.
        y_clip = jnp.dot(h[0:_R], wd_c, preferred_element_type=f32) + b_clip
        y_e4 = jnp.dot(h[_R:2 * _R], wd_e, preferred_element_type=f32) + b_e4

        clip = layer_norm(y_clip, g1, t1)        # (R, D) f32, pad rows = beta1
        e4 = layer_norm(y_e4, g2, t2)            # (R, D) f32, pad rows = beta2

        # extra_clip_out: Conv1d(77, 77, k=3, pad=1) along cond_dim.  One MXU pass
        # over the three stacked taps; the +/-1 lane shifts commute with the channel
        # matmul, so shift the products (non-negative rolls + hoisted edge masks).
        # wcv columns >= 77 are zero, so the beta-valued pad rows of e4 contribute 0.
        p = jnp.dot(wcv, e4.astype(cdt), preferred_element_type=f32)     # (3R, D)
        p0 = p[0:_R]
        p1 = p[_R:2 * _R]
        p2 = p[2 * _R:3 * _R]
        left = jnp.where(mask_l, 0.0, pltpu.roll(p0, shift=1, axis=1))        # p0[l-1]
        right = jnp.where(mask_r, 0.0, pltpu.roll(p2, shift=D - 1, axis=1))   # p2[l+1]
        total = clip + left + p1 + right + co_b

        # Only the final stores touch the unaligned 77-row shape.
        out_ref[i] = total[0:77].astype(out_ref.dtype)
        clip_ref[i] = clip[0:77].astype(clip_ref.dtype)
        return carry

    # fori_loop (not a static Python unroll) bounds per-iteration live ranges.
    lax.fori_loop(0, bt, body, None, unroll=2)

    # TODO(synk): second-order: fold the (2R,S)@(S,L) matmul across the whole batch
    # block (wrapper transpose to (S,B,L)) to better fill the 256-wide v6e/v7x MXU.


# ------------------------------------------------------------------- parameter packing
def pack_params(params, compute_dtype=jnp.bfloat16):
    """Fold + pack the module parameters into 4 lane-dense slabs (call once)."""
    f32 = jnp.float32
    p = {k: jnp.asarray(v, f32) for k, v in params.items()}
    S = p["cm_w1"].shape[1]
    L = p["dm_w"].shape[1]
    D = p["dm_w"].shape[0]
    Lp = _round_up(L, 8)

    # Fuse the two k=1 Conv1d's of each branch:  Wc = w2 @ w1, bc = w2 @ b1 + b2.
    wc_clip = p["cm_w2"] @ p["cm_w1"]
    bc_clip = p["cm_w2"] @ p["cm_b1"] + p["cm_b2"]
    wc_e4 = p["ec_w2"] @ p["ec_w1"]
    bc_e4 = p["ec_w2"] @ p["ec_b1"] + p["ec_b2"]

    wd_clip = p["dm_w"].T                      # (L, D)
    wd_e4 = p["ec_lw"].T

    # Fold the channel bias through the Linear into one dense (77, D) bias per branch.
    b_clip = jnp.outer(bc_clip, jnp.sum(wd_clip, axis=0)) + p["dm_b"][None, :]
    b_e4 = jnp.outer(bc_e4, jnp.sum(wd_e4, axis=0)) + p["ec_lb"][None, :]

    w_ch = (jnp.zeros((2 * _R, S), f32)
            .at[0:77].set(wc_clip)
            .at[_R:_R + 77].set(wc_e4))
    w_dim = (jnp.zeros((2 * Lp, D), f32)
             .at[0:L].set(wd_clip)
             .at[Lp:Lp + L].set(wd_e4))
    # K dim padded 77 -> 80 with EXACT zeros (keeps LN pad rows out of `extra`).
    w_conv = (jnp.zeros((3 * _R, _R), f32)
              .at[0:77, 0:77].set(p["co_w"][:, :, 0])
              .at[_R:_R + 77, 0:77].set(p["co_w"][:, :, 1])
              .at[2 * _R:2 * _R + 77, 0:77].set(p["co_w"][:, :, 2]))
    bias = (jnp.zeros((3 * _R + 8, D), f32)
            .at[0:77].set(b_clip)
            .at[_R:_R + 77].set(b_e4)
            .at[2 * _R:2 * _R + 77].set(jnp.broadcast_to(p["co_b"][:, None], (77, D)))
            .at[3 * _R + 0].set(p["ln_g"])
            .at[3 * _R + 1].set(p["ln_b"])
            .at[3 * _R + 2].set(p["ec_ln_g"])
            .at[3 * _R + 3].set(p["ec_ln_b"]))

    return (w_ch.astype(compute_dtype), w_dim.astype(compute_dtype),
            w_conv.astype(compute_dtype), bias)          # bias stays f32


def _pick_batch_block(B, per_elem_bytes):
    """Batch elements per grid step.

    Keeps the double-buffered input + output blocks comfortably inside the default
    scoped-VMEM budget (cap 32: per-step overhead fully amortized well before that).
    Tiny batches get a single step (v5e/v6e have one TensorCore, nothing to pipeline);
    otherwise at least 2 steps so v7x's two TensorCores both get work.
    """
    cap = int(max(1, min(32, (16 << 20) // max(int(per_elem_bytes), 1))))
    if B <= min(4, cap):
        return B
    return max(1, min(cap, -(-B // 2)))


# ----------------------------------------------------------------------------- wrapper
@functools.partial(jax.jit, static_argnames=("out_dtype",))
def fmri_to_semantic(x, packed, out_dtype=jnp.bfloat16):
    """x: (B, S, L) -> (out, clip_txt), both (B, 77, D) in `out_dtype`."""
    w_ch, w_dim, w_conv, bias = packed
    B, S, L = x.shape
    D = bias.shape[1]
    out_dt = np.dtype(out_dtype)

    per_elem = 2 * S * L * x.dtype.itemsize + 4 * 77 * D * out_dt.itemsize
    bt = _pick_batch_block(B, per_elem)
    grid = (pl.cdiv(B, bt),)          # ragged tail handled by Pallas partial blocks

    cost = pl.CostEstimate(
        flops=int(2 * B * (2 * _R * S * L + 2 * _R * L * D + 3 * _R * _R * D)),
        transcendentals=int(2 * B * _R),
        bytes_accessed=int(
            x.size * x.dtype.itemsize
            + sum(a.size * a.dtype.itemsize for a in (w_ch, w_dim, w_conv, bias))
            + 2 * B * 77 * D * out_dt.itemsize),
    )

    out, clip_txt = pl.pallas_call(
        _fmri_kernel,
        grid=grid,
        in_specs=[
            pl.BlockSpec((bt, S, L), lambda b: (b, 0, 0)),     # x stays f32; cast in-kernel
            pl.BlockSpec(w_ch.shape, lambda b: (0, 0)),
            pl.BlockSpec(w_dim.shape, lambda b: (0, 0)),
            pl.BlockSpec(w_conv.shape, lambda b: (0, 0)),
            pl.BlockSpec(bias.shape, lambda b: (0, 0)),
        ],
        out_specs=[
            pl.BlockSpec((bt, 77, D), lambda b: (b, 0, 0)),
            pl.BlockSpec((bt, 77, D), lambda b: (b, 0, 0)),
        ],
        out_shape=(
            jax.ShapeDtypeStruct((B, 77, D), out_dt),
            jax.ShapeDtypeStruct((B, 77, D), out_dt),
        ),
        compiler_params=pltpu.CompilerParams(dimension_semantics=("parallel",)),
        cost_estimate=cost,
    )(x, w_ch, w_dim, w_conv, bias)
    return out, clip_txt


# --------------------------------------------------------------------- init & reference
def init_params(key, cond_dim, fmri_seq_len, fmri_latent_dim, dtype=jnp.float32):
    half = fmri_seq_len // 2
    ks = jax.random.split(key, 12)
    s = 0.02

    def nrm(k, shape):
        return (s * jax.random.normal(k, shape)).astype(dtype)

    return {
        "cm_w1": nrm(ks[0], (half, fmri_seq_len)), "cm_b1": nrm(ks[1], (half,)),
        "cm_w2": nrm(ks[2], (77, half)),           "cm_b2": nrm(ks[3], (77,)),
        "dm_w": nrm(ks[4], (cond_dim, fmri_latent_dim)), "dm_b": nrm(ks[5], (cond_dim,)),
        "ln_g": jnp.ones((cond_dim,), dtype), "ln_b": jnp.zeros((cond_dim,), dtype),
        "ec_w1": nrm(ks[6], (half, fmri_seq_len)), "ec_b1": nrm(ks[7], (half,)),
        "ec_w2": nrm(ks[8], (77, half)),           "ec_b2": nrm(ks[9], (77,)),
        "ec_lw": nrm(ks[10], (cond_dim, fmri_latent_dim)), "ec_lb": nrm(ks[11], (cond_dim,)),
        "ec_ln_g": jnp.ones((cond_dim,), dtype), "ec_ln_b": jnp.zeros((cond_dim,), dtype),
        # extra_clip_out: zero_module(Conv1d(77, 77, 3, padding=1)) -> zeros at init
        "co_w": jnp.zeros((77, 77, 3), dtype), "co_b": jnp.zeros((77,), dtype),
    }


def reference(x, p):
    """Plain-JAX f32 reference reproducing the PyTorch forward."""
    f32 = jnp.float32
    x = x.astype(f32)

    def ln(y, g, b):
        mu = jnp.mean(y, axis=-1, keepdims=True)
        var = jnp.mean(jnp.square(y - mu), axis=-1, keepdims=True)
        return (y - mu) * lax.rsqrt(var + LN_EPS) * g + b

    def branch(w1, b1, w2, b2, lw, lb, g, bt):
        h1 = jnp.einsum("oc,bcl->bol", w1, x) + b1[None, :, None]
        h2 = jnp.einsum("oc,bcl->bol", w2, h1) + b2[None, :, None]
        y = jnp.einsum("bol,dl->bod", h2, lw) + lb
        return ln(y, g, bt)

    clip = branch(p["cm_w1"], p["cm_b1"], p["cm_w2"], p["cm_b2"],
                  p["dm_w"], p["dm_b"], p["ln_g"], p["ln_b"])
    e4 = branch(p["ec_w1"], p["ec_b1"], p["ec_w2"], p["ec_b2"],
                p["ec_lw"], p["ec_lb"], p["ec_ln_g"], p["ec_ln_b"])

    D = e4.shape[-1]
    pad = jnp.pad(e4, ((0, 0), (0, 0), (1, 1)))
    extra = sum(jnp.einsum("oc,bcl->bol", p["co_w"][:, :, k], pad[:, :, k:k + D])
                for k in range(3)) + p["co_b"][None, :, None]
    return clip + extra, clip


# ------------------------------------------------------------------------------- main
if __name__ == "__main__":
    # Small shapes consistent with the module: batch=2, fmri_seq_len=16 (so S//2=8),
    # fmri_latent_dim=128, cond_dim=128.
    B, SEQ, LATENT, COND = 2, 16, 128, 128

    key = jax.random.PRNGKey(0)
    kx, kp, kc = jax.random.split(key, 3)
    x = jax.random.normal(kx, (B, SEQ, LATENT), dtype=jnp.float32)
    params = init_params(kp, COND, SEQ, LATENT)

    # 1) exact-structure check: f32 compute + f32 outputs (module's actual init:
    #    zero conv-out branch).
    packed32 = pack_params(params, compute_dtype=jnp.float32)
    out32, clip32 = jax.block_until_ready(
        fmri_to_semantic(x, packed32, out_dtype=jnp.float32))
    out_ref, clip_ref = reference(x, params)
    assert out32.shape == (B, 77, COND) and clip32.shape == (B, 77, COND)
    assert jnp.allclose(out32, out_ref, atol=1e-4, rtol=1e-4)
    assert jnp.allclose(clip32, clip_ref, atol=1e-4, rtol=1e-4)

    # 2) exercise the k=3 conv path with non-zero weights (zero_module only at init).
    kc1, kc2 = jax.random.split(kc)
    params_rc = dict(params)
    params_rc["co_w"] = 0.02 * jax.random.normal(kc1, (77, 77, 3), dtype=jnp.float32)
    params_rc["co_b"] = 0.02 * jax.random.normal(kc2, (77,), dtype=jnp.float32)
    packed32_rc = pack_params(params_rc, compute_dtype=jnp.float32)
    out32b, clip32b = jax.block_until_ready(
        fmri_to_semantic(x, packed32_rc, out_dtype=jnp.float32))
    out_refb, clip_refb = reference(x, params_rc)
    assert jnp.allclose(out32b, out_refb, atol=1e-4, rtol=1e-4)
    assert jnp.allclose(clip32b, clip_refb, atol=1e-4, rtol=1e-4)

    # 3) ragged batch (B=5): exercises the cdiv grid + partial tail block path.
    x5 = jax.random.normal(jax.random.PRNGKey(1), (5, SEQ, LATENT), dtype=jnp.float32)
    out5, clip5 = jax.block_until_ready(
        fmri_to_semantic(x5, packed32_rc, out_dtype=jnp.float32))
    out_ref5, clip_ref5 = reference(x5, params_rc)
    assert jnp.allclose(out5, out_ref5, atol=1e-4, rtol=1e-4)
    assert jnp.allclose(clip5, clip_ref5, atol=1e-4, rtol=1e-4)

    # 4) default fast path: bf16 MXU matmuls + bf16 outputs (f32 accumulation and
    #    f32 LayerNorm math).  Compared against the f32 reference, so the tolerance
    #    reflects bf16 inputs + bf16 output rounding.
    outbf, clipbf = jax.block_until_ready(
        fmri_to_semantic(x, pack_params(params_rc)))     # defaults: bf16 / bf16 out
    assert outbf.dtype == jnp.bfloat16 and clipbf.dtype == jnp.bfloat16
    assert jnp.allclose(outbf.astype(jnp.float32), out_refb, atol=3e-2, rtol=3e-2)
    assert jnp.allclose(clipbf.astype(jnp.float32), clip_refb, atol=3e-2, rtol=3e-2)

    print("KERNEL_OK")
</pallas_src>

<mosaic_0001>
module attributes {stable_mosaic.version = 11 : i64} {
  func.func @_fmri_kernel(%arg0: i32, %arg1: memref<2x16x128xf32, #tpu.memory_space<vmem>>, %arg2: memref<160x16xf32, #tpu.memory_space<vmem>>, %arg3: memref<256x128xf32, #tpu.memory_space<vmem>>, %arg4: memref<240x80xf32, #tpu.memory_space<vmem>>, %arg5: memref<248x128xf32, #tpu.memory_space<vmem>>, %arg6: memref<2x77x128xf32, #tpu.memory_space<vmem>>, %arg7: memref<2x77x128xf32, #tpu.memory_space<vmem>>) attributes {dimension_semantics = [#tpu.dimension_semantics<parallel>], iteration_bounds = array<i64: 1>, scalar_prefetch = 0 : i64, scratch_operands = 0 : i64, tpu.core_type = #tpu.core_type<tc>, window_params = [{transform_indices = @transform_0, window_bounds = array<i64: 2, 16, 128>}, {pipeline_mode = #tpu.pipeline_mode<synchronous>, transform_indices = @transform_1, window_bounds = array<i64: 160, 16>}, {pipeline_mode = #tpu.pipeline_mode<synchronous>, transform_indices = @transform_2, window_bounds = array<i64: 256, 128>}, {pipeline_mode = #tpu.pipeline_mode<synchronous>, transform_indices = @transform_3, window_bounds = array<i64: 240, 80>}, {pipeline_mode = #tpu.pipeline_mode<synchronous>, transform_indices = @transform_4, window_bounds = array<i64: 248, 128>}, {transform_indices = @transform_5, window_bounds = array<i64: 2, 77, 128>}, {transform_indices = @transform_6, window_bounds = array<i64: 2, 77, 128>}]} {
    %c0 = arith.constant 0 : index
    %c0_0 = arith.constant 0 : index
    %0 = vector.load %arg2[%c0, %c0_0] : memref<160x16xf32, #tpu.memory_space<vmem>>, vector<160x16xf32>
    %c0_1 = arith.constant 0 : index
    %c0_2 = arith.constant 0 : index
    %1 = vector.load %arg3[%c0_1, %c0_2] : memref<256x128xf32, #tpu.memory_space<vmem>>, vector<256x128xf32>
    %c0_3 = arith.constant 0 : index
    %c0_4 = arith.constant 0 : index
    %2 = vector.load %arg4[%c0_3, %c0_4] : memref<240x80xf32, #tpu.memory_space<vmem>>, vector<240x80xf32>
    %c0_5 = arith.constant 0 : index
    %c0_6 = arith.constant 0 : index
    %3 = vector.load %arg5[%c0_5, %c0_6] : memref<248x128xf32, #tpu.memory_space<vmem>>, vector<248x128xf32>
    %4 = vector.extract_strided_slice %1 {offsets = [0, 0], sizes = [128, 128], strides = [1, 1]} : vector<256x128xf32> to vector<128x128xf32>
    %5 = vector.extract_strided_slice %1 {offsets = [128, 0], sizes = [128, 128], strides = [1, 1]} : vector<256x128xf32> to vector<128x128xf32>
    %6 = vector.extract_strided_slice %3 {offsets = [0, 0], sizes = [80, 128], strides = [1, 1]} : vector<248x128xf32> to vector<80x128xf32>
    %7 = vector.extract_strided_slice %3 {offsets = [80, 0], sizes = [80, 128], strides = [1, 1]} : vector<248x128xf32> to vector<80x128xf32>
    %8 = vector.extract_strided_slice %3 {offsets = [160, 0], sizes = [80, 128], strides = [1, 1]} : vector<248x128xf32> to vector<80x128xf32>
    %9 = vector.extract_strided_slice %3 {offsets = [240, 0], sizes = [1, 128], strides = [1, 1]} : vector<248x128xf32> to vector<1x128xf32>
    %10 = vector.extract_strided_slice %3 {offsets = [241, 0], sizes = [1, 128], strides = [1, 1]} : vector<248x128xf32> to vector<1x128xf32>
    %11 = vector.extract_strided_slice %3 {offsets = [242, 0], sizes = [1, 128], strides = [1, 1]} : vector<248x128xf32> to vector<1x128xf32>
    %12 = vector.extract_strided_slice %3 {offsets = [243, 0], sizes = [1, 128], strides = [1, 1]} : vector<248x128xf32> to vector<1x128xf32>
    %13 = tpu.iota {dimensions = array<i32: 1>} : vector<80x128xi32>
    %c0_i32 = arith.constant 0 : i32
    %14 = vector.broadcast %c0_i32 : i32 to vector<80x128xi32>
    %15 = arith.cmpi eq, %13, %14 : vector<80x128xi32>
    %c127_i32 = arith.constant 127 : i32
    %16 = vector.broadcast %c127_i32 : i32 to vector<80x128xi32>
    %17 = arith.cmpi eq, %13, %16 : vector<80x128xi32>
    %c0_i32_7 = arith.constant 0 : i32
    %18 = arith.index_cast %c0_i32_7 : i32 to index
    %c0_8 = arith.constant 0 : index
    %c0_9 = arith.constant 0 : index
    %19 = vector.load %arg1[%18, %c0_8, %c0_9] : memref<2x16x128xf32, #tpu.memory_space<vmem>>, vector<1x16x128xf32>
    %20 = vector.shape_cast %19 : vector<1x16x128xf32> to vector<16x128xf32>
    %cst = arith.constant dense<0.000000e+00> : vector<160x128xf32>
    %21 = tpu.matmul %0, %20, %cst {dimension_numbers = #tpu.dot_dimension_numbers<[1], [0], [0], [1], [0, 0, 1, 1], [], []>} : vector<160x16xf32>, vector<16x128xf32>, vector<160x128xf32> -> vector<160x128xf32>
    %22 = vector.extract_strided_slice %21 {offsets = [0, 0], sizes = [80, 128], strides = [1, 1]} : vector<160x128xf32> to vector<80x128xf32>
    %cst_10 = arith.constant dense<0.000000e+00> : vector<80x128xf32>
    %23 = tpu.matmul %22, %4, %cst_10 {dimension_numbers = #tpu.dot_dimension_numbers<[1], [0], [0], [1], [0, 0, 1, 1], [], []>} : vector<80x128xf32>, vector<128x128xf32>, vector<80x128xf32> -> vector<80x128xf32>
    %24 = arith.addf %23, %6 : vector<80x128xf32>
    %25 = vector.extract_strided_slice %21 {offsets = [80, 0], sizes = [80, 128], strides = [1, 1]} : vector<160x128xf32> to vector<80x128xf32>
    %cst_11 = arith.constant dense<0.000000e+00> : vector<80x128xf32>
    %26 = tpu.matmul %25, %5, %cst_11 {dimension_numbers = #tpu.dot_dimension_numbers<[1], [0], [0], [1], [0, 0, 1, 1], [], []>} : vector<80x128xf32>, vector<128x128xf32>, vector<80x128xf32> -> vector<80x128xf32>
    %27 = arith.addf %26, %7 : vector<80x128xf32>
    %cst_12 = arith.constant dense<0.000000e+00> : vector<80xf32>
    %28 = vector.multi_reduction <add>, %24, %cst_12 [1] : vector<80x128xf32> to vector<80xf32>
    %29 = vector.shape_cast %28 : vector<80xf32> to vector<80x1xf32>
    %cst_13 = arith.constant 7.812500e-03 : f32
    %30 = vector.broadcast %cst_13 : f32 to vector<80x1xf32>
    %31 = arith.mulf %29, %30 : vector<80x1xf32>
    %32 = vector.broadcast %31 : vector<80x1xf32> to vector<80x128xf32>
    %33 = arith.subf %24, %32 : vector<80x128xf32>
    %34 = arith.mulf %33, %33 : vector<80x128xf32>
    %cst_14 = arith.constant dense<0.000000e+00> : vector<80xf32>
    %35 = vector.multi_reduction <add>, %34, %cst_14 [1] : vector<80x128xf32> to vector<80xf32>
    %36 = vector.shape_cast %35 : vector<80xf32> to vector<80x1xf32>
    %cst_15 = arith.constant 7.812500e-03 : f32
    %37 = vector.broadcast %cst_15 : f32 to vector<80x1xf32>
    %38 = arith.mulf %36, %37 : vector<80x1xf32>
    %cst_16 = arith.constant 9.99999974E-6 : f32
    %39 = vector.broadcast %cst_16 : f32 to vector<80x1xf32>
    %40 = arith.addf %38, %39 : vector<80x1xf32>
    %41 = math.rsqrt %40 : vector<80x1xf32>
    %42 = vector.broadcast %41 : vector<80x1xf32> to vector<80x128xf32>
    %43 = arith.mulf %33, %42 : vector<80x128xf32>
    %44 = vector.broadcast %9 : vector<1x128xf32> to vector<80x128xf32>
    %45 = arith.mulf %43, %44 : vector<80x128xf32>
    %46 = vector.broadcast %10 : vector<1x128xf32> to vector<80x128xf32>
    %47 = arith.addf %45, %46 : vector<80x128xf32>
    %cst_17 = arith.constant dense<0.000000e+00> : vector<80xf32>
    %48 = vector.multi_reduction <add>, %27, %cst_17 [1] : vector<80x128xf32> to vector<80xf32>
    %49 = vector.shape_cast %48 : vector<80xf32> to vector<80x1xf32>
    %cst_18 = arith.constant 7.812500e-03 : f32
    %50 = vector.broadcast %cst_18 : f32 to vector<80x1xf32>
    %51 = arith.mulf %49, %50 : vector<80x1xf32>
    %52 = vector.broadcast %51 : vector<80x1xf32> to vector<80x128xf32>
    %53 = arith.subf %27, %52 : vector<80x128xf32>
    %54 = arith.mulf %53, %53 : vector<80x128xf32>
    %cst_19 = arith.constant dense<0.000000e+00> : vector<80xf32>
    %55 = vector.multi_reduction <add>, %54, %cst_19 [1] : vector<80x128xf32> to vector<80xf32>
    %56 = vector.shape_cast %55 : vector<80xf32> to vector<80x1xf32>
    %cst_20 = arith.constant 7.812500e-03 : f32
    %57 = vector.broadcast %cst_20 : f32 to vector<80x1xf32>
    %58 = arith.mulf %56, %57 : vector<80x1xf32>
    %cst_21 = arith.constant 9.99999974E-6 : f32
    %59 = vector.broadcast %cst_21 : f32 to vector<80x1xf32>
    %60 = arith.addf %58, %59 : vector<80x1xf32>
    %61 = math.rsqrt %60 : vector<80x1xf32>
    %62 = vector.broadcast %61 : vector<80x1xf32> to vector<80x128xf32>
    %63 = arith.mulf %53, %62 : vector<80x128xf32>
    %64 = vector.broadcast %11 : vector<1x128xf32> to vector<80x128xf32>
    %65 = arith.mulf %63, %64 : vector<80x128xf32>
    %66 = vector.broadcast %12 : vector<1x128xf32> to vector<80x128xf32>
    %67 = arith.addf %65, %66 : vector<80x128xf32>
    %cst_22 = arith.constant dense<0.000000e+00> : vector<240x128xf32>
    %68 = tpu.matmul %2, %67, %cst_22 {dimension_numbers = #tpu.dot_dimension_numbers<[1], [0], [0], [1], [0, 0, 1, 1], [], []>} : vector<240x80xf32>, vector<80x128xf32>, vector<240x128xf32> -> vector<240x128xf32>
    %69 = vector.extract_strided_slice %68 {offsets = [0, 0], sizes = [80, 128], strides = [1, 1]} : vector<240x128xf32> to vector<80x128xf32>
    %70 = vector.extract_strided_slice %68 {offsets = [80, 0], sizes = [80, 128], strides = [1, 1]} : vector<240x128xf32> to vector<80x128xf32>
    %71 = vector.extract_strided_slice %68 {offsets = [160, 0], sizes = [80, 128], strides = [1, 1]} : vector<240x128xf32> to vector<80x128xf32>
    %c1_i32 = arith.constant 1 : i32
    %72 = tpu.dynamic_rotate %69 by %c1_i32 dim 1 : vector<80x128xf32>, i32 -> vector<80x128xf32>
    %cst_23 = arith.constant 0.000000e+00 : f32
    %73 = vector.broadcast %cst_23 : f32 to vector<80x128xf32>
    %74 = arith.select %15, %73, %72 : vector<80x128xi1>, vector<80x128xf32>
    %c127_i32_24 = arith.constant 127 : i32
    %75 = tpu.dynamic_rotate %71 by %c127_i32_24 dim 1 : vector<80x128xf32>, i32 -> vector<80x128xf32>
    %cst_25 = arith.constant 0.000000e+00 : f32
    %76 = vector.broadcast %cst_25 : f32 to vector<80x128xf32>
    %77 = arith.select %17, %76, %75 : vector<80x128xi1>, vector<80x128xf32>
    %78 = arith.addf %47, %74 : vector<80x128xf32>
    %79 = arith.addf %78, %70 : vector<80x128xf32>
    %80 = arith.addf %79, %77 : vector<80x128xf32>
    %81 = arith.addf %80, %8 : vector<80x128xf32>
    %82 = vector.extract_strided_slice %81 {offsets = [0, 0], sizes = [77, 128], strides = [1, 1]} : vector<80x128xf32> to vector<77x128xf32>
    %83 = arith.index_cast %c0_i32_7 : i32 to index
    %c0_26 = arith.constant 0 : index
    %c0_27 = arith.constant 0 : index
    %84 = vector.load %arg6[%83, %c0_26, %c0_27] : memref<2x77x128xf32, #tpu.memory_space<vmem>>, vector<1x77x128xf32>
    %85 = vector.shape_cast %84 : vector<1x77x128xf32> to vector<77x128xf32>
    %86 = vector.shape_cast %82 : vector<77x128xf32> to vector<1x77x128xf32>
    tpu.vector_store %arg6[%83, %c0_26, %c0_27], %86 {strides = array<i32>} : memref<2x77x128xf32, #tpu.memory_space<vmem>>, vector<1x77x128xf32>,
    %87 = vector.extract_strided_slice %47 {offsets = [0, 0], sizes = [77, 128], strides = [1, 1]} : vector<80x128xf32> to vector<77x128xf32>
    %88 = arith.index_cast %c0_i32_7 : i32 to index
    %c0_28 = arith.constant 0 : index
    %c0_29 = arith.constant 0 : index
    %89 = vector.load %arg7[%88, %c0_28, %c0_29] : memref<2x77x128xf32, #tpu.memory_space<vmem>>, vector<1x77x128xf32>
    %90 = vector.shape_cast %89 : vector<1x77x128xf32> to vector<77x128xf32>
    %91 = vector.shape_cast %87 : vector<77x128xf32> to vector<1x77x128xf32>
    tpu.vector_store %arg7[%88, %c0_28, %c0_29], %91 {strides = array<i32>} : memref<2x77x128xf32, #tpu.memory_space<vmem>>, vector<1x77x128xf32>,
    %c1_i32_30 = arith.constant 1 : i32
    %92 = arith.index_cast %c1_i32_30 : i32 to index
    %c0_31 = arith.constant 0 : index
    %c0_32 = arith.constant 0 : index
    %93 = vector.load %arg1[%92, %c0_31, %c0_32] : memref<2x16x128xf32, #tpu.memory_space<vmem>>, vector<1x16x128xf32>
    %94 = vector.shape_cast %93 : vector<1x16x128xf32> to vector<16x128xf32>
    %cst_33 = arith.constant dense<0.000000e+00> : vector<160x128xf32>
    %95 = tpu.matmul %0, %94, %cst_33 {dimension_numbers = #tpu.dot_dimension_numbers<[1], [0], [0], [1], [0, 0, 1, 1], [], []>} : vector<160x16xf32>, vector<16x128xf32>, vector<160x128xf32> -> vector<160x128xf32>
    %96 = vector.extract_strided_slice %95 {offsets = [0, 0], sizes = [80, 128], strides = [1, 1]} : vector<160x128xf32> to vector<80x128xf32>
    %cst_34 = arith.constant dense<0.000000e+00> : vector<80x128xf32>
    %97 = tpu.matmul %96, %4, %cst_34 {dimension_numbers = #tpu.dot_dimension_numbers<[1], [0], [0], [1], [0, 0, 1, 1], [], []>} : vector<80x128xf32>, vector<128x128xf32>, vector<80x128xf32> -> vector<80x128xf32>
    %98 = arith.addf %97, %6 : vector<80x128xf32>
    %99 = vector.extract_strided_slice %95 {offsets = [80, 0], sizes = [80, 128], strides = [1, 1]} : vector<160x128xf32> to vector<80x128xf32>
    %cst_35 = arith.constant dense<0.000000e+00> : vector<80x128xf32>
    %100 = tpu.matmul %99, %5, %cst_35 {dimension_numbers = #tpu.dot_dimension_numbers<[1], [0], [0], [1], [0, 0, 1, 1], [], []>} : vector<80x128xf32>, vector<128x128xf32>, vector<80x128xf32> -> vector<80x128xf32>
    %101 = arith.addf %100, %7 : vector<80x128xf32>
    %cst_36 = arith.constant dense<0.000000e+00> : vector<80xf32>
    %102 = vector.multi_reduction <add>, %98, %cst_36 [1] : vector<80x128xf32> to vector<80xf32>
    %103 = vector.shape_cast %102 : vector<80xf32> to vector<80x1xf32>
    %cst_37 = arith.constant 7.812500e-03 : f32
    %104 = vector.broadcast %cst_37 : f32 to vector<80x1xf32>
    %105 = arith.mulf %103, %104 : vector<80x1xf32>
    %106 = vector.broadcast %105 : vector<80x1xf32> to vector<80x128xf32>
    %107 = arith.subf %98, %106 : vector<80x128xf32>
    %108 = arith.mulf %107, %107 : vector<80x128xf32>
    %cst_38 = arith.constant dense<0.000000e+00> : vector<80xf32>
    %109 = vector.multi_reduction <add>, %108, %cst_38 [1] : vector<80x128xf32> to vector<80xf32>
    %110 = vector.shape_cast %109 : vector<80xf32> to vector<80x1xf32>
    %cst_39 = arith.constant 7.812500e-03 : f32
    %111 = vector.broadcast %cst_39 : f32 to vector<80x1xf32>
    %112 = arith.mulf %110, %111 : vector<80x1xf32>
    %cst_40 = arith.constant 9.99999974E-6 : f32
    %113 = vector.broadcast %cst_40 : f32 to vector<80x1xf32>
    %114 = arith.addf %112, %113 : vector<80x1xf32>
    %115 = math.rsqrt %114 : vector<80x1xf32>
    %116 = vector.broadcast %115 : vector<80x1xf32> to vector<80x128xf32>
    %117 = arith.mulf %107, %116 : vector<80x128xf32>
    %118 = vector.broadcast %9 : vector<1x128xf32> to vector<80x128xf32>
    %119 = arith.mulf %117, %118 : vector<80x128xf32>
    %120 = vector.broadcast %10 : vector<1x128xf32> to vector<80x128xf32>
    %121 = arith.addf %119, %120 : vector<80x128xf32>
    %cst_41 = arith.constant dense<0.000000e+00> : vector<80xf32>
    %122 = vector.multi_reduction <add>, %101, %cst_41 [1] : vector<80x128xf32> to vector<80xf32>
    %123 = vector.shape_cast %122 : vector<80xf32> to vector<80x1xf32>
    %cst_42 = arith.constant 7.812500e-03 : f32
    %124 = vector.broadcast %cst_42 : f32 to vector<80x1xf32>
    %125 = arith.mulf %123, %124 : vector<80x1xf32>
    %126 = vector.broadcast %125 : vector<80x1xf32> to vector<80x128xf32>
    %127 = arith.subf %101, %126 : vector<80x128xf32>
    %128 = arith.mulf %127, %127 : vector<80x128xf32>
    %cst_43 = arith.constant dense<0.000000e+00> : vector<80xf32>
    %129 = vector.multi_reduction <add>, %128, %cst_43 [1] : vector<80x128xf32> to vector<80xf32>
    %130 = vector.shape_cast %129 : vector<80xf32> to vector<80x1xf32>
    %cst_44 = arith.constant 7.812500e-03 : f32
    %131 = vector.broadcast %cst_44 : f32 to vector<80x1xf32>
    %132 = arith.mulf %130, %131 : vector<80x1xf32>
    %cst_45 = arith.constant 9.99999974E-6 : f32
    %133 = vector.broadcast %cst_45 : f32 to vector<80x1xf32>
    %134 = arith.addf %132, %133 : vector<80x1xf32>
    %135 = math.rsqrt %134 : vector<80x1xf32>
    %136 = vector.broadcast %135 : vector<80x1xf32> to vector<80x128xf32>
    %137 = arith.mulf %127, %136 : vector<80x128xf32>
    %138 = vector.broadcast %11 : vector<1x128xf32> to vector<80x128xf32>
    %139 = arith.mulf %137, %138 : vector<80x128xf32>
    %140 = vector.broadcast %12 : vector<1x128xf32> to vector<80x128xf32>
    %141 = arith.addf %139, %140 : vector<80x128xf32>
    %cst_46 = arith.constant dense<0.000000e+00> : vector<240x128xf32>
    %142 = tpu.matmul %2, %141, %cst_46 {dimension_numbers = #tpu.dot_dimension_numbers<[1], [0], [0], [1], [0, 0, 1, 1], [], []>} : vector<240x80xf32>, vector<80x128xf32>, vector<240x128xf32> -> vector<240x128xf32>
    %143 = vector.extract_strided_slice %142 {offsets = [0, 0], sizes = [80, 128], strides = [1, 1]} : vector<240x128xf32> to vector<80x128xf32>
    %144 = vector.extract_strided_slice %142 {offsets = [80, 0], sizes = [80, 128], strides = [1, 1]} : vector<240x128xf32> to vector<80x128xf32>
    %145 = vector.extract_strided_slice %142 {offsets = [160, 0], sizes = [80, 128], strides = [1, 1]} : vector<240x128xf32> to vector<80x128xf32>
    %c1_i32_47 = arith.constant 1 : i32
    %146 = tpu.dynamic_rotate %143 by %c1_i32_47 dim 1 : vector<80x128xf32>, i32 -> vector<80x128xf32>
    %cst_48 = arith.constant 0.000000e+00 : f32
    %147 = vector.broadcast %cst_48 : f32 to vector<80x128xf32>
    %148 = arith.select %15, %147, %146 : vector<80x128xi1>, vector<80x128xf32>
    %c127_i32_49 = arith.constant 127 : i32
    %149 = tpu.dynamic_rotate %145 by %c127_i32_49 dim 1 : vector<80x128xf32>, i32 -> vector<80x128xf32>
    %cst_50 = arith.constant 0.000000e+00 : f32
    %150 = vector.broadcast %cst_50 : f32 to vector<80x128xf32>
    %151 = arith.select %17, %150, %149 : vector<80x128xi1>, vector<80x128xf32>
    %152 = arith.addf %121, %148 : vector<80x128xf32>
    %153 = arith.addf %152, %144 : vector<80x128xf32>
    %154 = arith.addf %153, %151 : vector<80x128xf32>
    %155 = arith.addf %154, %8 : vector<80x128xf32>
    %156 = vector.extract_strided_slice %155 {offsets = [0, 0], sizes = [77, 128], strides = [1, 1]} : vector<80x128xf32> to vector<77x128xf32>
    %157 = arith.index_cast %c1_i32_30 : i32 to index
    %c0_51 = arith.constant 0 : index
    %c0_52 = arith.constant 0 : index
    %158 = vector.load %arg6[%157, %c0_51, %c0_52] : memref<2x77x128xf32, #tpu.memory_space<vmem>>, vector<1x77x128xf32>
    %159 = vector.shape_cast %158 : vector<1x77x128xf32> to vector<77x128xf32>
    %160 = vector.shape_cast %156 : vector<77x128xf32> to vector<1x77x128xf32>
    tpu.vector_store %arg6[%157, %c0_51, %c0_52], %160 {strides = array<i32>} : memref<2x77x128xf32, #tpu.memory_space<vmem>>, vector<1x77x128xf32>,
    %161 = vector.extract_strided_slice %121 {offsets = [0, 0], sizes = [77, 128], strides = [1, 1]} : vector<80x128xf32> to vector<77x128xf32>
    %162 = arith.index_cast %c1_i32_30 : i32 to index
    %c0_53 = arith.constant 0 : index
    %c0_54 = arith.constant 0 : index
    %163 = vector.load %arg7[%162, %c0_53, %c0_54] : memref<2x77x128xf32, #tpu.memory_space<vmem>>, vector<1x77x128xf32>
    %164 = vector.shape_cast %163 : vector<1x77x128xf32> to vector<77x128xf32>
    %165 = vector.shape_cast %161 : vector<77x128xf32> to vector<1x77x128xf32>
    tpu.vector_store %arg7[%162, %c0_53, %c0_54], %165 {strides = array<i32>} : memref<2x77x128xf32, #tpu.memory_space<vmem>>, vector<1x77x128xf32>,
    %c2_i32 = arith.constant 2 : i32
    return
  }
  func.func @transform_0(%arg0: i32) -> (i32, i32, i32) {
    %c0_i32 = arith.constant 0 : i32
    %c0_i32_0 = arith.constant 0 : i32
    %c0_i32_1 = arith.constant 0 : i32
    return %arg0, %c0_i32, %c0_i32_0 : i32, i32, i32
  }
  func.func @transform_1(%arg0: i32) -> (i32, i32) {
    %c0_i32 = arith.constant 0 : i32
    %c0_i32_0 = arith.constant 0 : i32
    %c0_i32_1 = arith.constant 0 : i32
    return %c0_i32, %c0_i32_0 : i32, i32
  }
  func.func @transform_2(%arg0: i32) -> (i32, i32) {
    %c0_i32 = arith.constant 0 : i32
    %c0_i32_0 = arith.constant 0 : i32
    %c0_i32_1 = arith.constant 0 : i32
    return %c0_i32, %c0_i32_0 : i32, i32
  }
  func.func @transform_3(%arg0: i32) -> (i32, i32) {
    %c0_i32 = arith.constant 0 : i32
    %c0_i32_0 = arith.constant 0 : i32
    %c0_i32_1 = arith.constant 0 : i32
    return %c0_i32, %c0_i32_0 : i32, i32
  }
  func.func @transform_4(%arg0: i32) -> (i32, i32) {
    %c0_i32 = arith.constant 0 : i32
    %c0_i32_0 = arith.constant 0 : i32
    %c0_i32_1 = arith.constant 0 : i32
    return %c0_i32, %c0_i32_0 : i32, i32
  }
  func.func @transform_5(%arg0: i32) -> (i32, i32, i32) {
    %c0_i32 = arith.constant 0 : i32
    %c0_i32_0 = arith.constant 0 : i32
    %c0_i32_1 = arith.constant 0 : i32
    return %arg0, %c0_i32, %c0_i32_0 : i32, i32, i32
  }
  func.func @transform_6(%arg0: i32) -> (i32, i32, i32) {
    %c0_i32 = arith.constant 0 : i32
    %c0_i32_0 = arith.constant 0 : i32
    %c0_i32_1 = arith.constant 0 : i32
    return %arg0, %c0_i32, %c0_i32_0 : i32, i32, i32
  }
}

</mosaic_0001>

<bundles_post_ra>
// kernel: fmri_to_semantic.1
= control target key start
LH: loop header
LB: loop body
LE: loop exit
PB: predicated region body
PF: predicated region fallthrough
CT: control target
= control target key end

     0   :  { %vm141_vm0 = vcmask 130048   ;;  %vm873_vm1 = vcmask 654336   ;;  %s3308_s30 = smov 127   ;;  %s5124_s0 = inlined_call_operand.vmem [shape: f32[2,16,128], index: 0, kind: input, shape index: {}]   ;;  %s5125_s1 = inlined_call_operand.vmem [shape: f32[160,16], index: 1, kind: input, shape index: {}]   ;;  %s5126_s2 = inlined_call_operand.vmem [shape: f32[256,128], index: 2, kind: input, shape index: {}]   ;;  %s5127_s4 = inlined_call_operand.vmem [shape: f32[248,128], index: 4, kind: input, shape index: {}]   ;;  %s5128_s3 = inlined_call_operand.vmem [shape: f32[240,80], index: 3, kind: input, shape index: {}]   ;;  %s5129_s6 = inlined_call_operand.vmem [shape: f32[2,77,128], index: 6, kind: output, shape index: {1}]   ;;  %s5130_s5 = inlined_call_operand.vmem [shape: f32[2,77,128], index: 5, kind: output, shape index: {0}]  }
   0x1   :  { %v139_v0 = vld [vmem:[%s5124_s0] sm:$0xff]  ;;  %v140_v1 = vld [vmem:[%s5124_s0 + $0x8] sm:$0xff]  ;;  %v3365_v5 = vld [vmem:[%s5125_s1 + $0x10] sm:$0xff] }
   0x2   :  { %v3353_v2 = vld [vmem:[%s5125_s1] sm:$0xff]  ;;  %v3038_v3 = vpack.c.bf16 %v140_v1, %v139_v0  ;;  %v3360_v4 = vld [vmem:[%s5125_s1 + $0x8] sm:$0xff]  ;;  %v3380_v8 = vld [vmem:[%s5125_s1 + $0x18] sm:$0xff] }
   0x3   :  { %2656 = vmatprep.mubr.msk.f32.mxu0 %vm141_vm0, %v3353_v2  ;;  %v42_v6 = vld [vmem:[%s5126_s2] sm:$0xff]  ;;  %v43_v7 = vld [vmem:[%s5126_s2 + $0x8] sm:$0xff]  ;;  %v44_v10 = vld [vmem:[%s5126_s2 + $0x10] sm:$0xff] }
   0x4   :  { %3039 = vmatprep.subr.bf16.mxu0 %v3038_v3  ;;  %v3382_v9 = vpack.c.bf16 %v43_v7, %v42_v6  ;;  %v45_v11 = vld [vmem:[%s5126_s2 + $0x18] sm:$0xff]  ;;  %v3393_v12 = vld [vmem:[%s5125_s1 + $0x20] sm:$0xff]  ;;  %v47_v15 = vld [vmem:[%s5126_s2 + $0x28] sm:$0xff] }
   0x5   :  { %3041 = vmatpush3.bf16.msra.mxu0 %v3038_v3  ;;  %v3395_v13 = vpack.c.bf16 %v45_v11, %v44_v10  ;;  %v46_v14 = vld [vmem:[%s5126_s2 + $0x20] sm:$0xff]  ;;  %v59_v17 = vld [vmem:[%s5126_s2 + $0x88] sm:$0xff]  ;;  %v60_v19 = vld [vmem:[%s5126_s2 + $0x90] sm:$0xff] }
   0x6   :  { %3043 = vmatprep.subr.bf16.mxu1 %v3382_v9  ;;  %v58_v16 = vld [vmem:[%s5126_s2 + $0x80] sm:$0xff]  ;;  %v61_v20 = vld [vmem:[%s5126_s2 + $0x98] sm:$0xff]  ;;  %v3426_v21 = vld [vmem:[%s5125_s1 + $0x28] sm:$0xff]  ;;  %v3429_v22 = vpack.c.bf16 %v47_v15, %v46_v14 }
   0x7   :  { %3045 = vmatpush3.bf16.msra.mxu1 %v3382_v9  ;;  %v3413_v18 = vpack.c.bf16 %v59_v17, %v58_v16  ;;  %v3434_v23 = vld [vmem:[%s5125_s1 + $0x30] sm:$0xff]  ;;  %v49_v25 = vld [vmem:[%s5126_s2 + $0x38] sm:$0xff]  ;;  %v3443_v26 = vpack.c.bf16 %v61_v20, %v60_v19  ;;  %v62_v27 = vld [vmem:[%s5126_s2 + $0xa0] sm:$0xff] }
   0x8   :  { %2657 = vmatmul.mubr.msk.f32.vlgmr.msra.gmra.mrb[0].mxu0 %vm141_vm0, %v3360_v4  ;;  %3047 = vmatprep.subr.bf16.mxu1 %v3395_v13  ;;  %v48_v24 = vld [vmem:[%s5126_s2 + $0x30] sm:$0xff]  ;;  %v63_v28 = vld [vmem:[%s5126_s2 + $0xa8] sm:$0xff]  ;;  %v3460_v29 = vld [vmem:[%s5125_s1 + $0x38] sm:$0xff] }
   0x9   :  { %2659 = vmatprep.mubr.msk.f32.mxu0 %vm141_vm0, %v3365_v5  ;;  %3075 = vmatprep.subr.bf16.mxu0 %v3413_v18  ;;  %v3463_v30 = vpack.c.bf16 %v49_v25, %v48_v24  ;;  %v3468_v31 = vld [vmem:[%s5125_s1 + $0x40] sm:$0xff]  ;;  %v51_v33 = vld [vmem:[%s5126_s2 + $0x48] sm:$0xff]  ;;  %v3477_v34 = vpack.c.bf16 %v63_v28, %v62_v27  ;;  %v64_v35 = vld [vmem:[%s5126_s2 + $0xb0] sm:$0xff] }
   0xa   :  { %3077 = vmatpush3.bf16.msra.mxu0 %v3413_v18  ;;  %v50_v32 = vld [vmem:[%s5126_s2 + $0x40] sm:$0xff]  ;;  %v65_v36 = vld [vmem:[%s5126_s2 + $0xb8] sm:$0xff]  ;;  %v3494_v37 = vld [vmem:[%s5125_s1 + $0x48] sm:$0xff] }
   0xb   :  { %3049 = vmatpush3.bf16.msra.mxu1 %v3395_v13  ;;  %3079 = vmatprep.subr.bf16.mxu0 %v3443_v26  ;;  %v3497_v38 = vpack.c.bf16 %v51_v33, %v50_v32  ;;  %v3502_v39 = vld [vmem:[%s5125_s1 + $0x50] sm:$0xff]  ;;  %v53_v41 = vld [vmem:[%s5126_s2 + $0x58] sm:$0xff]  ;;  %v3511_v42 = vpack.c.bf16 %v65_v36, %v64_v35  ;;  %v3530_v45 = vld [vmem:[%s5125_s1 + $0x60] sm:$0xff] }
   0xc   :  { %2660 = vmatmul.mubr.msk.f32.gmra.mrb[2].mxu0 %vm141_vm0, %v3380_v8  ;;  %3051 = vmatprep.subr.bf16.mxu1 %v3429_v22  ;;  %v52_v40 = vld [vmem:[%s5126_s2 + $0x50] sm:$0xff]  ;;  %v3522_v43 = vld [vmem:[%s5125_s1 + $0x58] sm:$0xff]  ;;  %v54_v46 = vld [vmem:[%s5126_s2 + $0x60] sm:$0xff] }
   0xd   :  { %2662 = vmatprep.mubr.msk.f32.mxu0 %vm141_vm0, %v3393_v12  ;;  %v3525_v44 = vpack.c.bf16 %v53_v41, %v52_v40  ;;  %v55_v47 = vld [vmem:[%s5126_s2 + $0x68] sm:$0xff]  ;;  %v3556_v50 = vld [vmem:[%s5125_s1 + $0x70] sm:$0xff]  ;;  %v57_v52 = vld [vmem:[%s5126_s2 + $0x78] sm:$0xff] }
   0xe   :  { %3081 = vmatpush3.bf16.msra.mxu0 %v3443_v26  ;;  %v3548_v48 = vld [vmem:[%s5125_s1 + $0x68] sm:$0xff]  ;;  %v3551_v49 = vpack.c.bf16 %v55_v47, %v54_v46  ;;  %v56_v51 = vld [vmem:[%s5126_s2 + $0x70] sm:$0xff]  ;;  %v3572_v53 = vld [vmem:[%s5125_s1 + $0x78] sm:$0xff] }
   0xf   :  { %3053 = vmatpush3.bf16.msra.mxu1 %v3429_v22  ;;  %3083 = vmatprep.subr.bf16.mxu0 %v3477_v34  ;;  %v3575_v54 = vpack.c.bf16 %v57_v52, %v56_v51  ;;  %v3580_v55 = vld [vmem:[%s5125_s1 + $0x80] sm:$0xff]  ;;  %v3590_v56 = vld [vmem:[%s5125_s1 + $0x88] sm:$0xff]  ;;  %v3596_v57 = vld [vmem:[%s5125_s1 + $0x90] sm:$0xff] }
  0x10   :  { %2663 = vmatmul.mubr.msk.f32.gmra.mrb[4].mxu0 %vm141_vm0, %v3426_v21  ;;  %3055 = vmatprep.subr.bf16.mxu1 %v3463_v30  ;;  %v3606_v58 = vld [vmem:[%s5125_s1 + $0x98] sm:$0xff]  ;;  %v66_v59 = vld [vmem:[%s5126_s2 + $0xc0] sm:$0xff]  ;;  %v67_v60 = vld [vmem:[%s5126_s2 + $0xc8] sm:$0xff] }
  0x11   :  { %2665 = vmatprep.mubr.msk.f32.mxu0 %vm141_vm0, %v3434_v23  ;;  %v3616_v61 = vpack.c.bf16 %v67_v60, %v66_v59  ;;  %v68_v62 = vld [vmem:[%s5126_s2 + $0xd0] sm:$0xff]  ;;  %v69_v63 = vld [vmem:[%s5126_s2 + $0xd8] sm:$0xff]  ;;  %v70_v1 = vld [vmem:[%s5126_s2 + $0xe0] sm:$0xff] }
  0x12   :  { %3085 = vmatpush3.bf16.msra.mxu0 %v3477_v34  ;;  %v3626_v0 = vpack.c.bf16 %v69_v63, %v68_v62  ;;  %v71_v3 = vld [vmem:[%s5126_s2 + $0xe8] sm:$0xff]  ;;  %v72_v7 = vld [vmem:[%s5126_s2 + $0xf0] sm:$0xff]  ;;  %v73_v10 = vld [vmem:[%s5126_s2 + $0xf8] sm:$0xff] }
  0x13   :  { %3057 = vmatpush3.bf16.msra.mxu1 %v3463_v30  ;;  %3087 = vmatprep.subr.bf16.mxu0 %v3511_v42  ;;  %v3636_v6 = vpack.c.bf16 %v71_v3, %v70_v1  ;;  %v3646_v11 = vpack.c.bf16 %v73_v10, %v72_v7 }
  0x14   :  { %2666 = vmatmul.mubr.msk.f32.gmra.mrb[6].mxu0 %vm141_vm0, %v3460_v29  ;;  %3059 = vmatprep.subr.bf16.mxu1 %v3497_v38 }
  0x15   :  { %2668 = vmatprep.mubr.msk.f32.mxu0 %vm141_vm0, %v3468_v31 }
  0x16   :  { %3089 = vmatpush3.bf16.msra.mxu0 %v3511_v42 }
  0x17   :  { %3061 = vmatpush3.bf16.msra.mxu1 %v3497_v38  ;;  %3091 = vmatprep.subr.bf16.mxu0 %v3616_v61 }
  0x18   :  { %2669 = vmatmul.mubr.msk.f32.gmra.mrb[8].mxu0 %vm141_vm0, %v3494_v37  ;;  %3063 = vmatprep.subr.bf16.mxu1 %v3525_v44 }
  0x19   :  { %2671 = vmatprep.mubr.msk.f32.mxu0 %vm141_vm0, %v3502_v39 }
  0x1a   :  { %3093 = vmatpush3.bf16.msra.mxu0 %v3616_v61 }
  0x1b   :  { %3065 = vmatpush3.bf16.msra.mxu1 %v3525_v44  ;;  %3095 = vmatprep.subr.bf16.mxu0 %v3626_v0 }
  0x1c   :  { %2672 = vmatmul.mubr.msk.f32.gmra.mrb[10].mxu0 %vm141_vm0, %v3522_v43  ;;  %3067 = vmatprep.subr.bf16.mxu1 %v3551_v49 }
  0x1d   :  { %2674 = vmatprep.mubr.msk.f32.mxu0 %vm141_vm0, %v3530_v45 }
  0x1e   :  { %3097 = vmatpush3.bf16.msra.mxu0 %v3626_v0 }
  0x1f   :  { %3069 = vmatpush3.bf16.msra.mxu1 %v3551_v49  ;;  %3099 = vmatprep.subr.bf16.mxu0 %v3636_v6 }
  0x20   :  { %2675 = vmatmul.mubr.msk.f32.gmra.mrb[12].mxu0 %vm141_vm0, %v3548_v48  ;;  %3071 = vmatprep.subr.bf16.mxu1 %v3575_v54 }
  0x21   :  { %2677 = vmatprep.mubr.msk.f32.mxu0 %vm141_vm0, %v3556_v50 }
  0x22   :  { %3101 = vmatpush3.bf16.msra.mxu0 %v3636_v6 }
  0x23   :  { %3073 = vmatpush3.bf16.msra.mxu1 %v3575_v54  ;;  %3103 = vmatprep.subr.bf16.mxu0 %v3646_v11 }
  0x24   :  { %2678 = vmatmul.mubr.msk.f32.gmra.mrb[14].mxu0 %vm141_vm0, %v3572_v53 }
  0x25   :  { %2680 = vmatprep.mubr.msk.f32.mxu0 %vm141_vm0, %v3580_v55 }
  0x26   :  { %3105 = vmatpush3.bf16.msra.mxu0 %v3646_v11 }
  0x28   :  { %2681 = vmatmul.mubr.msk.f32.gmra.mrb[16].mxu0 %vm141_vm0, %v3590_v56 }
  0x29   :  { %2683 = vmatprep.mubr.msk.f32.mxu0 %vm141_vm0, %v3596_v57 }
  0x2c   :  { %2684 = vmatmul.mubr.msk.f32.gmra.mrb[18].mxu0 %vm141_vm0, %v3606_v58 }
  0xdb   :  { %v2658_v14 = vpop.f32.mrb[0].mxu0 }
  0xdc   :  { %v268_v15 = vpop.f32.mrb[1].mxu0 }
  0xdd   :  { %2718 = vmatprep.mubr.f32.mxu1 %v268_v15 }
  0xde   :  { %2719 = vmatmul.mubr.f32.vlgmr.msra.gmra.mrb[0].mxu1 %v2658_v14 }
  0xdf   :  { %v2661_v16 = vpop.f32.mrb[2].mxu0 }
  0xe0   :  { %v278_v17 = vpop.f32.mrb[3].mxu0 }
  0xe1   :  { %2721 = vmatprep.mubr.f32.mxu1 %v278_v17 }
  0xe2   :  { %2722 = vmatmul.mubr.f32.gmra.mrb[2].mxu1 %v2661_v16 }
  0xe3   :  { %v2664_v19 = vpop.f32.mrb[4].mxu0 }
  0xe4   :  { %v288_v20 = vpop.f32.mrb[5].mxu0 }
  0xe5   :  { %2724 = vmatprep.mubr.f32.mxu1 %v288_v20  ;;  %v3683_v20 = vld [vmem:[%s5127_s4 + $0x68] sm:$0xff] }
  0xe6   :  { %2725 = vmatmul.mubr.f32.gmra.mrb[4].mxu1 %v2664_v19 }
  0xe7   :  { %v2667_v24 = vpop.f32.mrb[6].mxu0 }
  0xe8   :  { %v298_v25 = vpop.f32.mrb[7].mxu0 }
  0xe9   :  { %2727 = vmatprep.mubr.f32.mxu1 %v298_v25 }
  0xea   :  { %2728 = vmatmul.mubr.f32.gmra.mrb[6].mxu1 %v2667_v24  ;;  %v3688_v24 = vld [vmem:[%s5127_s4 + $0x58] sm:$0xff] }
  0xeb   :  { %v2670_v27 = vpop.f32.mrb[8].mxu0 }
  0xec   :  { %v308_v28 = vpop.f32.mrb[9].mxu0 }
  0xed   :  { %2730 = vmatprep.mubr.f32.mxu1 %v308_v28 }
  0xee   :  { %2731 = vmatmul.mubr.f32.gmra.mrb[8].mxu1 %v2670_v27 }
  0xef   :  { %v2673_v32 = vpop.f32.mrb[10].mxu0 }
  0xf0   :  { %v318_v33 = vpop.f32.mrb[11].mxu0 }
  0xf1   :  { %2765 = vmatprep.mubr.f32.mxu0 %v318_v33  ;;  %v3700_v33 = vld [vmem:[%s5127_s4 + $0x60] sm:$0xff] }
  0xf2   :  { %2766 = vmatmul.mubr.f32.vlgmr.msra.gmra.mrb[20].mxu0 %v2673_v32 }
  0xf3   :  { %v2676_v35 = vpop.f32.mrb[12].mxu0 }
  0xf4   :  { %v328_v36 = vpop.f32.mrb[13].mxu0 }
  0xf5   :  { %2768 = vmatprep.mubr.f32.mxu0 %v328_v36 }
  0xf6   :  { %2769 = vmatmul.mubr.f32.gmra.mrb[22].mxu0 %v2676_v35  ;;  %v3706_v35 = vld [vmem:[%s5127_s4 + $0x70] sm:$0xff] }
  0xf7   :  { %v2679_v40 = vpop.f32.mrb[14].mxu0 }
  0xf8   :  { %v338_v41 = vpop.f32.mrb[15].mxu0 }
  0xf9   :  { %2771 = vmatprep.mubr.f32.mxu0 %v338_v41 }
  0xfa   :  { %2772 = vmatmul.mubr.f32.gmra.mrb[24].mxu0 %v2679_v40 }
  0xfb   :  { %v2682_v46 = vpop.f32.mrb[16].mxu0 }
  0xfc   :  { %v348_v47 = vpop.f32.mrb[17].mxu0 }
  0xfd   :  { %2774 = vmatprep.mubr.f32.mxu0 %v348_v47 }
  0xfe   :  { %2775 = vmatmul.mubr.f32.gmra.mrb[26].mxu0 %v2682_v46  ;;  %v3715_v46 = vld [vmem:[%s5127_s4 + $0x78] sm:$0xff] }
  0xff   :  { %v2685_v51 = vpop.f32.mrb[18].mxu0 }
 0x100   :  { %v358_v52 = vpop.f32.mrb[19].mxu0 }
 0x101   :  { %2777 = vmatprep.mubr.f32.mxu0 %v358_v52 }
 0x102   :  { %2778 = vmatmul.mubr.f32.gmra.mrb[28].mxu0 %v2685_v51  ;;  %v3724_v51 = vld [vmem:[%s5127_s4 + $0x80] sm:$0xff] }
 0x103   :  { %2849 = vmatprep.mubr.msk.f32.mxu0 %vm141_vm0, %v3353_v2  ;;  %v3675_v2 = vld [vmem:[%s5127_s4 + $0x50] sm:$0xff] }
 0x1b1   :  { %v3652_v59 = vpop.f32.mrb[0].mxu1 }
 0x1b2   :  { %v3654_v60 = vpop.f32.mrb[1].mxu1 }
 0x1b5   :  { %v3656_v62 = vpop.f32.mrb[2].mxu1 }
 0x1b6   :  { %v3658_v63 = vpop.f32.mrb[3].mxu1 }
 0x1b9   :  { %v3660_v1 = vpop.f32.mrb[4].mxu1 }
 0x1ba   :  { %5149 = vst [vmem:[#allocation2_spill] sm:$0xff] %v3660_v1  ;;  %v3662_v3 = vpop.f32.mrb[5].mxu1 }
 0x1bb   :  { %5150 = vst [vmem:[#allocation3_spill] sm:$0xff] %v3662_v3  ;;  %v2353_v3 = vld [vmem:[%s5124_s0 + $0x18] sm:$0xff] }
 0x1bd   :  { %v3664_v7 = vpop.f32.mrb[6].mxu1 }
 0x1be   :  { %5151 = vst [vmem:[#allocation4_spill] sm:$0xff] %v3664_v7  ;;  %v3666_v10 = vpop.f32.mrb[7].mxu1  ;;  %v2352_v7 = vld [vmem:[%s5124_s0 + $0x10] sm:$0xff]  ;;  %s3307_s0 = smov 1  }
 0x1bf   :  { %5152 = vst [vmem:[#allocation5_spill] sm:$0xff] %v3666_v10  ;;  %v3751_v10 = vld [vmem:[%s5127_s4 + $0x98] sm:$0xff] }
 0x1c1   :  { %v3668_v14 = vpop.f32.mrb[8].mxu1 }
 0x1c2   :  { %5153 = vst [vmem:[#allocation6_spill] sm:$0xff] %v3668_v14  ;;  %v3670_v15 = vpop.f32.mrb[9].mxu1 }
 0x1c3   :  { %5154 = vst [vmem:[#allocation7_spill] sm:$0xff] %v3670_v15 }
 0x1c5   :  { %v2767_v16 = vpop.f32.mrb[20].mxu0 }
 0x1c6   :  { %v548_v17 = vpop.f32.mrb[21].mxu0  ;;  %v3695_v32 = vadd.f32 %v2767_v16, %v3688_v24 }
 0x1c7   :  { %v3678_v19 = vadd.f32 %v548_v17, %v3675_v2 }
 0x1c9   :  { %v2770_v25 = vpop.f32.mrb[22].mxu0  ;;  %735 = vadd.xlane.f32.xlu0 %v3678_v19 }
 0x1ca   :  { %v3692_v27 = vadd.f32 %v2770_v25, %v3683_v20  ;;  %v558_v28 = vpop.f32.mrb[23].mxu0  ;;  %v3733_v25 = vld [vmem:[%s5127_s4 + $0x88] sm:$0xff] }
 0x1cb   :  { %v3710_v40 = vadd.f32 %v558_v28, %v3700_v33 }
 0x1cc   :  { %741 = vadd.xlane.f32.xlu1 %v3692_v27 }
 0x1cd   :  { %v2773_v36 = vpop.f32.mrb[24].mxu0  ;;  %737 = vadd.xlane.f32.xlu0 %v3695_v32 }
 0x1ce   :  { %v568_v41 = vpop.f32.mrb[25].mxu0  ;;  %v3728_v16 = vadd.f32 %v2773_v36, %v3715_v46 }
 0x1cf   :  { %v3718_v47 = vadd.f32 %v568_v41, %v3706_v35  ;;  %v3742_v41 = vld [vmem:[%s5127_s4 + $0x90] sm:$0xff] }
 0x1d0   :  { %739 = vadd.xlane.f32.xlu1 %v3710_v40 }
 0x1d1   :  { %v2776_v52 = vpop.f32.mrb[26].mxu0  ;;  %743 = vadd.xlane.f32.xlu0 %v3718_v47 }
 0x1d2   :  { %v578_v17 = vpop.f32.mrb[27].mxu0  ;;  %v3746_v36 = vadd.f32 %v2776_v52, %v3733_v25  ;;  %v3126_v52 = vpack.c.bf16 %v2353_v3, %v2352_v7 }
 0x1d3   :  { %v3736_v28 = vadd.f32 %v578_v17, %v3724_v51 }
 0x1d4   :  { %745 = vadd.xlane.f32.xlu1 %v3728_v16  ;;  %3127 = vmatprep.subr.bf16.mxu0 %v3126_v52 }
 0x1d5   :  { %v2779_v15 = vpop.f32.mrb[28].mxu0  ;;  %747 = vadd.xlane.f32.xlu0 %v3736_v28  ;;  %3129 = vmatpush3.bf16.msra.mxu0 %v3126_v52 }
 0x1d6   :  { %v588_v14 = vpop.f32.mrb[29].mxu0  ;;  %v3765_v1 = vadd.f32 %v2779_v15, %v3751_v10  ;;  %3131 = vmatprep.subr.bf16.mxu0 %v3382_v9 }
 0x1d7   :  { %v3754_v17 = vadd.f32 %v588_v14, %v3742_v41 }
 0x1d8   :  { %749 = vadd.xlane.f32.xlu1 %v3746_v36  ;;  %2850 = vmatmul.mubr.msk.f32.vlgmr.msra.gmra.mrb[30].mxu0 %vm141_vm0, %v3360_v4 }
 0x1d9   :  { %751 = vadd.xlane.f32.xlu0 %v3754_v17  ;;  %2852 = vmatprep.mubr.msk.f32.mxu0 %vm141_vm0, %v3365_v5 }
 0x1da   :  { %3133 = vmatpush3.bf16.msra.mxu0 %v3382_v9 }
 0x1db   :  { %3135 = vmatprep.subr.bf16.mxu0 %v3395_v13 }
 0x1dc   :  { %753 = vadd.xlane.f32.xlu1 %v3765_v1  ;;  %2853 = vmatmul.mubr.msk.f32.gmra.mrb[32].mxu0 %vm141_vm0, %v3380_v8 }
 0x1dd   :  { %2855 = vmatprep.mubr.msk.f32.mxu0 %vm141_vm0, %v3393_v12 }
 0x1de   :  { %3137 = vmatpush3.bf16.msra.mxu0 %v3395_v13 }
 0x1df   :  { %3139 = vmatprep.subr.bf16.mxu0 %v3429_v22 }
 0x1e0   :  { %2856 = vmatmul.mubr.msk.f32.gmra.mrb[34].mxu0 %vm141_vm0, %v3426_v21 }
 0x1e1   :  { %2858 = vmatprep.mubr.msk.f32.mxu0 %vm141_vm0, %v3434_v23 }
 0x1e2   :  { %3141 = vmatpush3.bf16.msra.mxu0 %v3429_v22 }
 0x1e3   :  { %3143 = vmatprep.subr.bf16.mxu0 %v3463_v30 }
 0x1e4   :  { %2859 = vmatmul.mubr.msk.f32.gmra.mrb[36].mxu0 %vm141_vm0, %v3460_v29 }
 0x1e5   :  { %2861 = vmatprep.mubr.msk.f32.mxu0 %vm141_vm0, %v3468_v31 }
 0x1e6   :  { %3145 = vmatpush3.bf16.msra.mxu0 %v3463_v30 }
 0x1e7   :  { %3147 = vmatprep.subr.bf16.mxu0 %v3497_v38 }
 0x1e8   :  { %2862 = vmatmul.mubr.msk.f32.gmra.mrb[38].mxu0 %vm141_vm0, %v3494_v37 }
 0x1e9   :  { %2864 = vmatprep.mubr.msk.f32.mxu0 %vm141_vm0, %v3502_v39 }
 0x1ea   :  { %3149 = vmatpush3.bf16.msra.mxu0 %v3497_v38 }
 0x1eb   :  { %3151 = vmatprep.subr.bf16.mxu0 %v3525_v44 }
 0x1ec   :  { %2865 = vmatmul.mubr.msk.f32.gmra.mrb[40].mxu0 %vm141_vm0, %v3522_v43 }
 0x1ed   :  { %2867 = vmatprep.mubr.msk.f32.mxu0 %vm141_vm0, %v3530_v45 }
 0x1ee   :  { %3153 = vmatpush3.bf16.msra.mxu0 %v3525_v44 }
 0x1ef   :  { %3155 = vmatprep.subr.bf16.mxu0 %v3551_v49 }
 0x1f0   :  { %2868 = vmatmul.mubr.msk.f32.gmra.mrb[42].mxu0 %vm141_vm0, %v3548_v48 }
 0x1f1   :  { %2870 = vmatprep.mubr.msk.f32.mxu0 %vm141_vm0, %v3556_v50 }
 0x1f2   :  { %3157 = vmatpush3.bf16.msra.mxu0 %v3551_v49 }
 0x1f3   :  { %3159 = vmatprep.subr.bf16.mxu0 %v3575_v54 }
 0x1f4   :  { %2871 = vmatmul.mubr.msk.f32.gmra.mrb[44].mxu0 %vm141_vm0, %v3572_v53 }
 0x1f5   :  { %2873 = vmatprep.mubr.msk.f32.mxu0 %vm141_vm0, %v3580_v55 }
 0x1f6   :  { %3161 = vmatpush3.bf16.msra.mxu0 %v3575_v54 }
 0x1f8   :  { %2874 = vmatmul.mubr.msk.f32.gmra.mrb[46].mxu0 %vm141_vm0, %v3590_v56 }
 0x1f9   :  { %2876 = vmatprep.mubr.msk.f32.mxu0 %vm141_vm0, %v3596_v57 }
 0x1fc   :  { %2877 = vmatmul.mubr.msk.f32.gmra.mrb[48].mxu0 %vm141_vm0, %v3606_v58 }
 0x256   :  { %v736_v4 = vpop.xlane.xlu0 %735 }
 0x257   :  { %v755_v5 = vmul.f32 0.0078125, %v736_v4  ;;  %v74_v4 = vld [vmem:[%s5128_s3] sm:$0xff] }
 0x258   :  { %2800 = vmatprep.mubr.msk.f32.mxu1 %vm873_vm1, %v74_v4 }
 0x259   :  { %v742_v8 = vpop.xlane.xlu1 %741  ;;  %v3823_v9 = vsub.f32 %v3678_v19, %v755_v5 }
 0x25a   :  { %v738_v12 = vpop.xlane.xlu0 %737  ;;  %v758_v13 = vmul.f32 0.0078125, %v742_v8 }
 0x25b   :  { %v756_v21 = vmul.f32 0.0078125, %v738_v12  ;;  %v775_v22 = vmul.f32 %v3823_v9, %v3823_v9 }
 0x25c   :  { %v3833_v39 = vsub.f32 %v3692_v27, %v758_v13 }
 0x25d   :  { %v740_v23 = vpop.xlane.xlu1 %739  ;;  %785 = vadd.xlane.f32.xlu0 %v775_v22  ;;  %v3828_v29 = vsub.f32 %v3695_v32, %v756_v21 }
 0x25e   :  { %v757_v30 = vmul.f32 0.0078125, %v740_v23  ;;  %v744_v31 = vpop.xlane.xlu0 %743  ;;  %v778_v54 = vmul.f32 %v3833_v39, %v3833_v39 }
 0x25f   :  { %v759_v37 = vmul.f32 0.0078125, %v744_v31  ;;  %v776_v38 = vmul.f32 %v3828_v29, %v3828_v29 }
 0x260   :  { %v3836_v43 = vsub.f32 %v3710_v40, %v757_v30 }
 0x261   :  { %v746_v44 = vpop.xlane.xlu1 %745  ;;  %787 = vadd.xlane.f32.xlu1 %v776_v38  ;;  %v3841_v50 = vsub.f32 %v3718_v47, %v759_v37 }
 0x262   :  { %v760_v45 = vmul.f32 0.0078125, %v746_v44  ;;  %v748_v48 = vpop.xlane.xlu0 %747  ;;  %v777_v49 = vmul.f32 %v3836_v43, %v3836_v43 }
 0x263   :  { %v761_v53 = vmul.f32 0.0078125, %v748_v48  ;;  %v779_v3 = vmul.f32 %v3841_v50, %v3841_v50 }
 0x264   :  { %789 = vadd.xlane.f32.xlu0 %v777_v49  ;;  %v3846_v55 = vsub.f32 %v3728_v16, %v760_v45 }
 0x265   :  { %v750_v56 = vpop.xlane.xlu1 %749  ;;  %791 = vadd.xlane.f32.xlu1 %v778_v54  ;;  %v3853_v14 = vsub.f32 %v3736_v28, %v761_v53 }
 0x266   :  { %v762_v57 = vmul.f32 0.0078125, %v750_v56  ;;  %v752_v58 = vpop.xlane.xlu0 %751  ;;  %v780_v7 = vmul.f32 %v3846_v55, %v3846_v55 }
 0x267   :  { %v763_v15 = vmul.f32 0.0078125, %v752_v58  ;;  %v781_v40 = vmul.f32 %v3853_v14, %v3853_v14 }
 0x268   :  { %793 = vadd.xlane.f32.xlu0 %v779_v3  ;;  %v3856_v19 = vsub.f32 %v3746_v36, %v762_v57 }
 0x269   :  { %v754_v27 = vpop.xlane.xlu1 %753  ;;  %795 = vadd.xlane.f32.xlu1 %v780_v7  ;;  %v3863_v16 = vsub.f32 %v3754_v17, %v763_v15  ;;  %v5131_v15 = vlaneseq }
 0x26a   :  { %v764_v32 = vmul.f32 0.0078125, %v754_v27  ;;  %v782_v47 = vmul.f32 %v3856_v19, %v3856_v19 }
 0x26b   :  { %v783_v36 = vmul.f32 %v3863_v16, %v3863_v16 }
 0x26c   :  { %797 = vadd.xlane.f32.xlu0 %v781_v40  ;;  %v3866_v28 = vsub.f32 %v3765_v1, %v764_v32 }
 0x26d   :  { %799 = vadd.xlane.f32.xlu1 %v782_v47 }
 0x26e   :  { %v784_v52 = vmul.f32 %v3866_v28, %v3866_v28 }
 0x270   :  { %801 = vadd.xlane.f32.xlu0 %v783_v36 }
 0x271   :  { %803 = vadd.xlane.f32.xlu1 %v784_v52  ;;  %v3898_v52 = vshrl.u32 %v5131_v15, 7 }
 0x273   :  { %5155 = vst [vmem:[#allocation8_spill] sm:$0xff] %v3898_v52 }
 0x2ab   :  { %v2851_v17 = vpop.f32.mrb[30].mxu0 }
 0x2ac   :  { %v1368_v5 = vpop.f32.mrb[31].mxu0 }
 0x2ad   :  { %2911 = vmatprep.mubr.f32.mxu0 %v1368_v5 }
 0x2ae   :  { %2912 = vmatmul.mubr.f32.vlgmr.msra.gmra.mrb[50].mxu0 %v2851_v17 }
 0x2af   :  { %v2854_v1 = vpop.f32.mrb[32].mxu0 }
 0x2b0   :  { %v1378_v8 = vpop.f32.mrb[33].mxu0 }
 0x2b1   :  { %2914 = vmatprep.mubr.f32.mxu0 %v1378_v8 }
 0x2b2   :  { %2915 = vmatmul.mubr.f32.gmra.mrb[52].mxu0 %v2854_v1 }
 0x2b3   :  { %v2857_v12 = vpop.f32.mrb[34].mxu0 }
 0x2b4   :  { %v1388_v13 = vpop.f32.mrb[35].mxu0 }
 0x2b5   :  { %2917 = vmatprep.mubr.f32.mxu0 %v1388_v13  ;;  %v847_v13 = vsub.s32 2, %v3898_v52 }
 0x2b6   :  { %2918 = vmatmul.mubr.f32.gmra.mrb[54].mxu0 %v2857_v12 }
 0x2b7   :  { %v2860_v21 = vpop.f32.mrb[36].mxu0 }
 0x2b8   :  { %v1398_v22 = vpop.f32.mrb[37].mxu0 }
 0x2b9   :  { %2920 = vmatprep.mubr.f32.mxu0 %v1398_v22  ;;  %v134_v22 = vld [vmem:[%s5127_s4 + $0xf0] sm:$0xff] }
 0x2ba   :  { %2921 = vmatmul.mubr.f32.gmra.mrb[56].mxu0 %v2860_v21 }
 0x2bb   :  { %v2863_v23 = vpop.f32.mrb[38].mxu0 }
 0x2bc   :  { %v1408_v30 = vpop.f32.mrb[39].mxu0 }
 0x2bd   :  { %2923 = vmatprep.mubr.f32.mxu0 %v1408_v30 }
 0x2be   :  { %2924 = vmatmul.mubr.f32.gmra.mrb[58].mxu0 %v2863_v23 }
 0x2bf   :  { %2993 = vmatprep.mubr.msk.f32.mxu0 %vm873_vm1, %v74_v4  ;;  %v3877_v31 = vpop.f32.mrb[40].mxu0 }
 0x2c0   :  { %v3879_v37 = vpop.f32.mrb[41].mxu0 }
 0x2c3   :  { %v3881_v38 = vpop.f32.mrb[42].mxu0 }
 0x2c4   :  { %v3883_v44 = vpop.f32.mrb[43].mxu0 }
 0x2c7   :  { %v3885_v45 = vpop.f32.mrb[44].mxu0 }
 0x2c8   :  { %v3887_v48 = vpop.f32.mrb[45].mxu0 }
 0x2cb   :  { %v3889_v49 = vpop.f32.mrb[46].mxu0 }
 0x2cc   :  { %v3891_v53 = vpop.f32.mrb[47].mxu0 }
 0x2cf   :  { %v3893_v54 = vpop.f32.mrb[48].mxu0 }
 0x2d0   :  { %v3895_v56 = vpop.f32.mrb[49].mxu0 }
 0x2ea   :  { %v786_v57 = vpop.xlane.xlu0 %785 }
 0x2eb   :  { %v805_v58 = vmul.f32 0.0078125, %v786_v57 }
 0x2ed   :  { %v815_v3 = vadd.f32 1e-05, %v805_v58 }
 0x2ee   :  { %v788_v7 = vpop.xlane.xlu1 %787 }
 0x2ef   :  { %3226 = vrsqrt.f32 %v815_v3  ;;  %v806_v27 = vmul.f32 0.0078125, %v788_v7  ;;  %v861_v3 = vsub.s32 3, %v3898_v52 }
 0x2f1   :  { %v816_v32 = vadd.f32 1e-05, %v806_v27  ;;  %v790_v40 = vpop.xlane.xlu0 %789 }
 0x2f2   :  { %v807_v47 = vmul.f32 0.0078125, %v790_v40  ;;  %v792_v36 = vpop.xlane.xlu1 %791  ;;  %v3906_v40 = vrot.slane %v134_v22, %v847_v13 }
 0x2f3   :  { %3228 = vrsqrt.f32 %v816_v32  ;;  %v808_v4 = vmul.f32 0.0078125, %v792_v36 }
 0x2f4   :  { %v817_v17 = vadd.f32 1e-05, %v807_v47 }
 0x2f5   :  { %v818_v5 = vadd.f32 1e-05, %v808_v4  ;;  %v794_v1 = vpop.xlane.xlu0 %793 }
 0x2f6   :  { %3230 = vrsqrt.f32 %v817_v17  ;;  %v809_v8 = vmul.f32 0.0078125, %v794_v1  ;;  %v796_v12 = vpop.xlane.xlu1 %795  ;;  %v3908_v1 = vrot.slane %v134_v22, %v861_v3 }
 0x2f7   :  { %3232 = vrsqrt.f32 %v818_v5  ;;  %v810_v21 = vmul.f32 0.0078125, %v796_v12 }
 0x2f8   :  { %v819_v23 = vadd.f32 1e-05, %v809_v8 }
 0x2f9   :  { %v3227_v30 = vpop.eup %3226  ;;  %v820_v57 = vadd.f32 1e-05, %v810_v21  ;;  %v798_v58 = vpop.xlane.xlu0 %797 }
 0x2fa   :  { %3234 = vrsqrt.f32 %v819_v23  ;;  %v811_v7 = vmul.f32 0.0078125, %v798_v58  ;;  %v800_v27 = vpop.xlane.xlu1 %799  ;;  %v835_v32 = vmul.f32 %v3227_v30, %v3823_v9 }
 0x2fb   :  { %3236 = vrsqrt.f32 %v820_v57  ;;  %v812_v47 = vmul.f32 0.0078125, %v800_v27 }
 0x2fc   :  { %v821_v36 = vadd.f32 1e-05, %v811_v7  ;;  %v849_v23 = vmul.f32 %v3906_v40, %v835_v32 }
 0x2fd   :  { %v3229_v4 = vpop.eup %3228  ;;  %v822_v17 = vadd.f32 1e-05, %v812_v47  ;;  %v802_v5 = vpop.xlane.xlu0 %801 }
 0x2fe   :  { %3238 = vrsqrt.f32 %v821_v36  ;;  %v813_v8 = vmul.f32 0.0078125, %v802_v5  ;;  %v804_v12 = vpop.xlane.xlu1 %803  ;;  %v836_v21 = vmul.f32 %v3229_v4, %v3828_v29  ;;  %v863_v22 = vadd.f32 %v3908_v1, %v849_v23 }
 0x2ff   :  { %3240 = vrsqrt.f32 %v822_v17  ;;  %v814_v58 = vmul.f32 0.0078125, %v804_v12 }
 0x300   :  { %v3231_v9 = vpop.eup %3230  ;;  %v823_v13 = vadd.f32 1e-05, %v813_v8  ;;  %v850_v30 = vmul.f32 %v3906_v40, %v836_v21 }
 0x301   :  { %v3233_v57 = vpop.eup %3232  ;;  %v824_v7 = vadd.f32 1e-05, %v814_v58  ;;  %v837_v27 = vmul.f32 %v3231_v9, %v3836_v43 }
 0x302   :  { %3242 = vrsqrt.f32 %v823_v13  ;;  %v864_v3 = vadd.f32 %v3908_v1, %v850_v30  ;;  %v838_v47 = vmul.f32 %v3233_v57, %v3833_v39 }
 0x303   :  { %3244 = vrsqrt.f32 %v824_v7  ;;  %v851_v29 = vmul.f32 %v3906_v40, %v837_v27 }
 0x304   :  { %v3235_v32 = vpop.eup %3234  ;;  %v3106_v36 = vpack.c.bf16 %v864_v3, %v863_v22  ;;  %v852_v4 = vmul.f32 %v3906_v40, %v838_v47 }
 0x305   :  { %v3237_v17 = vpop.eup %3236  ;;  %v865_v5 = vadd.f32 %v3908_v1, %v851_v29  ;;  %v839_v8 = vmul.f32 %v3235_v32, %v3841_v50 }
 0x306   :  { %3107 = vmatprep.subr.bf16.mxu1 %v3106_v36  ;;  %v866_v43 = vadd.f32 %v3908_v1, %v852_v4  ;;  %v840_v12 = vmul.f32 %v3237_v17, %v3846_v55 }
 0x307   :  { %3109 = vmatpush3.bf16.msra.mxu1 %v3106_v36  ;;  %v853_v39 = vmul.f32 %v3906_v40, %v839_v8 }
 0x308   :  { %v3239_v21 = vpop.eup %3238  ;;  %v3110_v23 = vpack.c.bf16 %v866_v43, %v865_v5  ;;  %v854_v58 = vmul.f32 %v3906_v40, %v840_v12  ;;  %v3958_v43 = vld [vmem:[%s5128_s3 + $0x18] sm:$0xff]  ;;  %v3963_v12 = vld [vmem:[%s5128_s3 + $0x20] sm:$0xff] }
 0x309   :  { %v3241_v9 = vpop.eup %3240  ;;  %v867_v13 = vadd.f32 %v3908_v1, %v853_v39  ;;  %v841_v30 = vmul.f32 %v3239_v21, %v3853_v14  ;;  %v3979_v39 = vld [vmem:[%s5128_s3 + $0x30] sm:$0xff]  ;;  %v3989_v21 = vld [vmem:[%s5128_s3 + $0x38] sm:$0xff] }
 0x30a   :  { %3111 = vmatprep.subr.bf16.mxu1 %v3110_v23  ;;  %v868_v50 = vadd.f32 %v3908_v1, %v854_v58  ;;  %v842_v57 = vmul.f32 %v3241_v9, %v3856_v19  ;;  %v4021_v58 = vld [vmem:[%s5128_s3 + $0x58] sm:$0xff]  ;;  %v4037_v9 = vld [vmem:[%s5128_s3 + $0x68] sm:$0xff] }
 0x30b   :  { %3113 = vmatpush3.bf16.msra.mxu1 %v3110_v23  ;;  %v855_v55 = vmul.f32 %v3906_v40, %v841_v30  ;;  %v4005_v23 = vld [vmem:[%s5128_s3 + $0x48] sm:$0xff]  ;;  %5157 = vst [vmem:[#allocation10_spill] sm:$0xff] %v4021_v58  ;;  %5159 = vst [vmem:[#allocation12_spill] sm:$0xff] %v4037_v9 }
 0x30c   :  { %v3243_v7 = vpop.eup %3242  ;;  %v3114_v27 = vpack.c.bf16 %v868_v50, %v867_v13  ;;  %v856_v22 = vmul.f32 %v3906_v40, %v842_v57  ;;  %v4053_v13 = vld [vmem:[%s5128_s3 + $0x78] sm:$0xff]  ;;  %v4069_v30 = vld [vmem:[%s5128_s3 + $0x88] sm:$0xff]  ;;  %v4086_v57 = vld [vmem:[%s5128_s3 + $0xa0] sm:$0xff] }
 0x30d   :  { %v3245_v3 = vpop.eup %3244  ;;  %v869_v47 = vadd.f32 %v3908_v1, %v855_v55  ;;  %v843_v29 = vmul.f32 %v3243_v7, %v3863_v16  ;;  %v3942_v16 = vld [vmem:[%s5128_s3 + $0x8] sm:$0xff]  ;;  %5161 = vst [vmem:[#allocation14_spill] sm:$0xff] %v4053_v13  ;;  %5163 = vst [vmem:[#allocation16_spill] sm:$0xff] %v4069_v30  ;;  %v4081_v50 = vld [vmem:[%s5128_s3 + $0x98] sm:$0xff] }
 0x30e   :  { %3115 = vmatprep.subr.bf16.mxu1 %v3114_v27  ;;  %v870_v14 = vadd.f32 %v3908_v1, %v856_v22  ;;  %v844_v32 = vmul.f32 %v3245_v3, %v3866_v28  ;;  %v3948_v28 = vld [vmem:[%s5128_s3 + $0x10] sm:$0xff]  ;;  %v4109_v7 = vld [vmem:[%s5128_s3 + $0xb8] sm:$0xff]  ;;  %v4123_v22 = vld [vmem:[%s5128_s3 + $0xc8] sm:$0xff] }
 0x30f   :  { %3117 = vmatpush3.bf16.msra.mxu1 %v3114_v27  ;;  %v857_v19 = vmul.f32 %v3906_v40, %v843_v29  ;;  %v4100_v55 = vld [vmem:[%s5128_s3 + $0xb0] sm:$0xff]  ;;  %v4114_v27 = vld [vmem:[%s5128_s3 + $0xc0] sm:$0xff] }
 0x310   :  { %v3118_v36 = vpack.c.bf16 %v870_v14, %v869_v47  ;;  %v858_v4 = vmul.f32 %v3906_v40, %v844_v32  ;;  %v4128_v3 = vld [vmem:[%s5128_s3 + $0xd0] sm:$0xff]  ;;  %v4137_v47 = vld [vmem:[%s5128_s3 + $0xd8] sm:$0xff]  ;;  %v4142_v29 = vld [vmem:[%s5128_s3 + $0xe0] sm:$0xff] }
 0x311   :  { %v871_v17 = vadd.f32 %v3908_v1, %v857_v19  ;;  %5164 = vst [vmem:[#allocation17_spill] sm:$0xff] %v4137_v47  ;;  %5165 = vst [vmem:[#allocation18_spill] sm:$0xff] %v4142_v29  ;;  %v4151_v14 = vld [vmem:[%s5128_s3 + $0xe8] sm:$0xff] }
 0x312   :  { %3119 = vmatprep.subr.bf16.mxu1 %v3118_v36  ;;  %v872_v5 = vadd.f32 %v3908_v1, %v858_v4  ;;  %5166 = vst [vmem:[#allocation19_spill] sm:$0xff] %v4151_v14 }
 0x313   :  { %3121 = vmatpush3.bf16.msra.mxu1 %v3118_v36 }
 0x314   :  { %v3122_v8 = vpack.c.bf16 %v872_v5, %v871_v17 }
 0x316   :  { %3123 = vmatprep.subr.bf16.mxu1 %v3122_v8 }
 0x317   :  { %3125 = vmatpush3.bf16.msra.mxu1 %v3122_v8 }
 0x318   :  { %3163 = vmatprep.subr.bf16.mxu1 %v3413_v18 }
 0x31a   :  { %2801 = vmatmul.mubr.msk.f32.vlgmr.msra.gmra.mrb[10].mxu1 %vm873_vm1, %v3942_v16 }
 0x31b   :  { %3165 = vmatpush3.bf16.msra.mxu1 %v3413_v18  ;;  %2803 = vmatprep.mubr.msk.f32.mxu1 %vm873_vm1, %v3948_v28  ;;  %v3973_v18 = vld [vmem:[%s5128_s3 + $0x28] sm:$0xff] }
 0x31c   :  { %3167 = vmatprep.subr.bf16.mxu1 %v3443_v26 }
 0x31e   :  { %2804 = vmatmul.mubr.msk.f32.gmra.mrb[12].mxu1 %vm873_vm1, %v3958_v43 }
 0x31f   :  { %2806 = vmatprep.mubr.msk.f32.mxu1 %vm873_vm1, %v3963_v12  ;;  %3169 = vmatpush3.bf16.msra.mxu1 %v3443_v26  ;;  %v3995_v26 = vld [vmem:[%s5128_s3 + $0x40] sm:$0xff] }
 0x320   :  { %3171 = vmatprep.subr.bf16.mxu1 %v3477_v34 }
 0x322   :  { %2807 = vmatmul.mubr.msk.f32.gmra.mrb[14].mxu1 %vm873_vm1, %v3973_v18 }
 0x323   :  { %2809 = vmatprep.mubr.msk.f32.mxu1 %vm873_vm1, %v3979_v39  ;;  %3173 = vmatpush3.bf16.msra.mxu1 %v3477_v34  ;;  %v4011_v34 = vld [vmem:[%s5128_s3 + $0x50] sm:$0xff] }
 0x324   :  { %3175 = vmatprep.subr.bf16.mxu1 %v3511_v42  ;;  %5156 = vst [vmem:[#allocation9_spill] sm:$0xff] %v4011_v34 }
 0x326   :  { %2810 = vmatmul.mubr.msk.f32.gmra.mrb[16].mxu1 %vm873_vm1, %v3989_v21 }
 0x327   :  { %2812 = vmatprep.mubr.msk.f32.mxu1 %vm873_vm1, %v3995_v26  ;;  %3177 = vmatpush3.bf16.msra.mxu1 %v3511_v42  ;;  %v4027_v42 = vld [vmem:[%s5128_s3 + $0x60] sm:$0xff] }
 0x328   :  { %3179 = vmatprep.subr.bf16.mxu1 %v3616_v61  ;;  %5158 = vst [vmem:[#allocation11_spill] sm:$0xff] %v4027_v42 }
 0x32a   :  { %2813 = vmatmul.mubr.msk.f32.gmra.mrb[18].mxu1 %vm873_vm1, %v4005_v23 }
 0x32b   :  { %2815 = vmatprep.mubr.msk.f32.mxu1 %vm873_vm1, %v4011_v34  ;;  %3181 = vmatpush3.bf16.msra.mxu1 %v3616_v61  ;;  %v4043_v61 = vld [vmem:[%s5128_s3 + $0x70] sm:$0xff] }
 0x32c   :  { %3183 = vmatprep.subr.bf16.mxu1 %v3626_v0  ;;  %5160 = vst [vmem:[#allocation13_spill] sm:$0xff] %v4043_v61 }
 0x32e   :  { %2816 = vmatmul.mubr.msk.f32.gmra.mrb[20].mxu1 %vm873_vm1, %v4021_v58 }
 0x32f   :  { %2818 = vmatprep.mubr.msk.f32.mxu1 %vm873_vm1, %v4027_v42  ;;  %3185 = vmatpush3.bf16.msra.mxu1 %v3626_v0  ;;  %v4059_v0 = vld [vmem:[%s5128_s3 + $0x80] sm:$0xff] }
 0x330   :  { %3187 = vmatprep.subr.bf16.mxu1 %v3636_v6  ;;  %5162 = vst [vmem:[#allocation15_spill] sm:$0xff] %v4059_v0 }
 0x332   :  { %2819 = vmatmul.mubr.msk.f32.gmra.mrb[22].mxu1 %vm873_vm1, %v4037_v9 }
 0x333   :  { %2821 = vmatprep.mubr.msk.f32.mxu1 %vm873_vm1, %v4043_v61  ;;  %3189 = vmatpush3.bf16.msra.mxu1 %v3636_v6  ;;  %v92_v6 = vld [vmem:[%s5128_s3 + $0x90] sm:$0xff] }
 0x334   :  { %3191 = vmatprep.subr.bf16.mxu1 %v3646_v11 }
 0x336   :  { %2822 = vmatmul.mubr.msk.f32.gmra.mrb[24].mxu1 %vm873_vm1, %v4053_v13 }
 0x337   :  { %2824 = vmatprep.mubr.msk.f32.mxu1 %vm873_vm1, %v4059_v0  ;;  %3193 = vmatpush3.bf16.msra.mxu1 %v3646_v11  ;;  %v4095_v11 = vld [vmem:[%s5128_s3 + $0xa8] sm:$0xff] }
 0x33a   :  { %2825 = vmatmul.mubr.msk.f32.gmra.mrb[26].mxu1 %vm873_vm1, %v4069_v30 }
 0x33b   :  { %2827 = vmatprep.mubr.msk.f32.mxu1 %vm873_vm1, %v92_v6 }
 0x33e   :  { %2828 = vmatmul.mubr.msk.f32.gmra.mrb[28].mxu1 %vm873_vm1, %v4081_v50 }
 0x33f   :  { %2830 = vmatprep.mubr.msk.f32.mxu1 %vm873_vm1, %v4086_v57 }
 0x342   :  { %2831 = vmatmul.mubr.msk.f32.gmra.mrb[30].mxu1 %vm873_vm1, %v4095_v11 }
 0x343   :  { %2833 = vmatprep.mubr.msk.f32.mxu1 %vm873_vm1, %v4100_v55 }
 0x346   :  { %2834 = vmatmul.mubr.msk.f32.gmra.mrb[32].mxu1 %vm873_vm1, %v4109_v7 }
 0x347   :  { %2836 = vmatprep.mubr.msk.f32.mxu1 %vm873_vm1, %v4114_v27 }
 0x34a   :  { %2837 = vmatmul.mubr.msk.f32.gmra.mrb[34].mxu1 %vm873_vm1, %v4123_v22 }
 0x34b   :  { %2839 = vmatprep.mubr.msk.f32.mxu1 %vm873_vm1, %v4128_v3 }
 0x34e   :  { %2840 = vmatmul.mubr.msk.f32.gmra.mrb[36].mxu1 %vm873_vm1, %v4137_v47 }
 0x34f   :  { %2842 = vmatprep.mubr.msk.f32.mxu1 %vm873_vm1, %v4142_v29 }
 0x352   :  { %2843 = vmatmul.mubr.msk.f32.gmra.mrb[38].mxu1 %vm873_vm1, %v4151_v14  ;;  %v112_v14 = vld [vmem:[%s5127_s4 + $0x40] sm:$0xff] }
 0x353   :  { %2958 = vmatprep.mubr.f32.mxu1 %v3879_v37 }
 0x356   :  { %2959 = vmatmul.mubr.f32.vlgmr.msra.gmra.mrb[40].mxu1 %v3877_v31 }
 0x357   :  { %2961 = vmatprep.mubr.f32.mxu1 %v3883_v44 }
 0x35a   :  { %2962 = vmatmul.mubr.f32.gmra.mrb[42].mxu1 %v3881_v38 }
 0x35b   :  { %2964 = vmatprep.mubr.f32.mxu1 %v3887_v48 }
 0x35e   :  { %2965 = vmatmul.mubr.f32.gmra.mrb[44].mxu1 %v3885_v45 }
 0x35f   :  { %2967 = vmatprep.mubr.f32.mxu1 %v3891_v53 }
 0x362   :  { %2968 = vmatmul.mubr.f32.gmra.mrb[46].mxu1 %v3889_v49 }
 0x363   :  { %2970 = vmatprep.mubr.f32.mxu1 %v3895_v56 }
 0x366   :  { %2971 = vmatmul.mubr.f32.gmra.mrb[48].mxu1 %v3893_v54 }
 0x367   :  { %3020 = vmatprep.mubr.msk.f32.mxu1 %vm873_vm1, %v92_v6 }
 0x381   :  { %v4166_v37 = vpop.f32.mrb[50].mxu0 }
 0x382   :  { %v4168_v31 = vpop.f32.mrb[51].mxu0 }
 0x385   :  { %v4170_v44 = vpop.f32.mrb[52].mxu0 }
 0x386   :  { %v4172_v38 = vpop.f32.mrb[53].mxu0 }
 0x389   :  { %v4174_v48 = vpop.f32.mrb[54].mxu0 }
 0x38a   :  { %v4176_v45 = vpop.f32.mrb[55].mxu0 }
 0x38d   :  { %v4178_v53 = vpop.f32.mrb[56].mxu0 }
 0x38e   :  { %v4180_v49 = vpop.f32.mrb[57].mxu0 }
 0x391   :  { %v4182_v56 = vpop.f32.mrb[58].mxu0 }
 0x392   :  { %v4184_v54 = vpop.f32.mrb[59].mxu0 }
 0x3ed   :  { %v4186_v32 = vpop.f32.mrb[10].mxu1 }
 0x3ee   :  { %v4188_v19 = vpop.f32.mrb[11].mxu1 }
 0x3ef   :  { %5167 = vst [vmem:[#allocation20_spill] sm:$0xff] %v4188_v19 }
 0x3f1   :  { %v4190_v36 = vpop.f32.mrb[12].mxu1 }
 0x3f2   :  { %5168 = vst [vmem:[#allocation21_spill] sm:$0xff] %v4190_v36  ;;  %v4192_v4 = vpop.f32.mrb[13].mxu1 }
 0x3f3   :  { %5169 = vst [vmem:[#allocation22_spill] sm:$0xff] %v4192_v4  ;;  %v5200_v4 = vld [vmem:[#allocation6_spill] sm:$0xff] }
 0x3f5   :  { %v4194_v17 = vpop.f32.mrb[14].mxu1 }
 0x3f6   :  { %5170 = vst [vmem:[#allocation23_spill] sm:$0xff] %v4194_v17  ;;  %v4196_v5 = vpop.f32.mrb[15].mxu1 }
 0x3f7   :  { %5171 = vst [vmem:[#allocation24_spill] sm:$0xff] %v4196_v5 }
 0x3f9   :  { %v4198_v8 = vpop.f32.mrb[16].mxu1 }
 0x3fa   :  { %5172 = vst [vmem:[#allocation25_spill] sm:$0xff] %v4198_v8  ;;  %v4200_v6 = vpop.f32.mrb[17].mxu1 }
 0x3fb   :  { %5173 = vst [vmem:[#allocation26_spill] sm:$0xff] %v4200_v6 }
 0x3fd   :  { %v4202_v15 = vpop.f32.mrb[18].mxu1 }
 0x3fe   :  { %5174 = vst [vmem:[#allocation27_spill] sm:$0xff] %v4202_v15  ;;  %v4204_v52 = vpop.f32.mrb[19].mxu1 }
 0x3ff   :  { %5175 = vst [vmem:[#allocation28_spill] sm:$0xff] %v4204_v52 }
 0x401   :  { %v4206_v30 = vpop.f32.mrb[20].mxu1 }
 0x402   :  { %5176 = vst [vmem:[#allocation29_spill] sm:$0xff] %v4206_v30  ;;  %v4208_v0 = vpop.f32.mrb[21].mxu1 }
 0x403   :  { %5177 = vst [vmem:[#allocation30_spill] sm:$0xff] %v4208_v0 }
 0x405   :  { %v4210_v13 = vpop.f32.mrb[22].mxu1 }
 0x406   :  { %5178 = vst [vmem:[#allocation31_spill] sm:$0xff] %v4210_v13  ;;  %v4212_v61 = vpop.f32.mrb[23].mxu1 }
 0x407   :  { %5179 = vst [vmem:[#allocation32_spill] sm:$0xff] %v4212_v61 }
 0x409   :  { %v4214_v9 = vpop.f32.mrb[24].mxu1 }
 0x40a   :  { %5180 = vst [vmem:[#allocation33_spill] sm:$0xff] %v4214_v9  ;;  %v4216_v17 = vpop.f32.mrb[25].mxu1 }
 0x40b   :  { %5181 = vst [vmem:[#allocation34_spill] sm:$0xff] %v4216_v17 }
 0x40d   :  { %v4218_v5 = vpop.f32.mrb[26].mxu1 }
 0x40e   :  { %5182 = vst [vmem:[#allocation35_spill] sm:$0xff] %v4218_v5  ;;  %v4220_v8 = vpop.f32.mrb[27].mxu1 }
 0x40f   :  { %5183 = vst [vmem:[#allocation36_spill] sm:$0xff] %v4220_v8 }
 0x411   :  { %v4222_v6 = vpop.f32.mrb[28].mxu1 }
 0x412   :  { %5184 = vst [vmem:[#allocation37_spill] sm:$0xff] %v4222_v6  ;;  %v4224_v15 = vpop.f32.mrb[29].mxu1 }
 0x413   :  { %5185 = vst [vmem:[#allocation38_spill] sm:$0xff] %v4224_v15 }
 0x415   :  { %v4226_v52 = vpop.f32.mrb[30].mxu1 }
 0x416   :  { %5186 = vst [vmem:[#allocation39_spill] sm:$0xff] %v4226_v52  ;;  %v4228_v30 = vpop.f32.mrb[31].mxu1 }
 0x417   :  { %5187 = vst [vmem:[#allocation40_spill] sm:$0xff] %v4228_v30 }
 0x419   :  { %v4230_v0 = vpop.f32.mrb[32].mxu1 }
 0x41a   :  { %5188 = vst [vmem:[#allocation41_spill] sm:$0xff] %v4230_v0  ;;  %v4232_v13 = vpop.f32.mrb[33].mxu1 }
 0x41b   :  { %5189 = vst [vmem:[#allocation42_spill] sm:$0xff] %v4232_v13 }
 0x41d   :  { %v4234_v61 = vpop.f32.mrb[34].mxu1 }
 0x41e   :  { %5190 = vst [vmem:[#allocation43_spill] sm:$0xff] %v4234_v61  ;;  %v4236_v9 = vpop.f32.mrb[35].mxu1 }
 0x41f   :  { %5191 = vst [vmem:[#allocation44_spill] sm:$0xff] %v4236_v9 }
 0x421   :  { %v4238_v17 = vpop.f32.mrb[36].mxu1 }
 0x422   :  { %5192 = vst [vmem:[#allocation45_spill] sm:$0xff] %v4238_v17  ;;  %v4240_v5 = vpop.f32.mrb[37].mxu1 }
 0x423   :  { %5193 = vst [vmem:[#allocation46_spill] sm:$0xff] %v4240_v5 }
 0x425   :  { %v4242_v8 = vpop.f32.mrb[38].mxu1 }
 0x426   :  { %5194 = vst [vmem:[#allocation47_spill] sm:$0xff] %v4242_v8  ;;  %v4244_v6 = vpop.f32.mrb[39].mxu1 }
 0x427   :  { %5195 = vst [vmem:[#allocation48_spill] sm:$0xff] %v4244_v6 }
 0x429   :  { %v2960_v15 = vpop.f32.mrb[40].mxu1 }
 0x42a   :  { %v1654_v52 = vadd.f32 %v2960_v15, %v3688_v24  ;;  %v1648_v30 = vpop.f32.mrb[41].mxu1 }
 0x42b   :  { %v1649_v0 = vadd.f32 %v1648_v30, %v3675_v2 }
 0x42c   :  { %1829 = vadd.xlane.f32.xlu1 %v1654_v52 }
 0x42d   :  { %v2963_v13 = vpop.f32.mrb[42].mxu1  ;;  %1827 = vadd.xlane.f32.xlu0 %v1649_v0 }
 0x42e   :  { %v1664_v61 = vadd.f32 %v2963_v13, %v3683_v20  ;;  %v1658_v9 = vpop.f32.mrb[43].mxu1 }
 0x42f   :  { %v1659_v17 = vadd.f32 %v1658_v9, %v3700_v33 }
 0x430   :  { %1833 = vadd.xlane.f32.xlu1 %v1664_v61 }
 0x431   :  { %v2966_v5 = vpop.f32.mrb[44].mxu1  ;;  %1831 = vadd.xlane.f32.xlu0 %v1659_v17 }
 0x432   :  { %v1674_v8 = vadd.f32 %v2966_v5, %v3715_v46  ;;  %v1668_v6 = vpop.f32.mrb[45].mxu1 }
 0x433   :  { %v1669_v36 = vadd.f32 %v1668_v6, %v3706_v35 }
 0x434   :  { %1837 = vadd.xlane.f32.xlu1 %v1674_v8 }
 0x435   :  { %v2969_v24 = vpop.f32.mrb[46].mxu1  ;;  %1835 = vadd.xlane.f32.xlu0 %v1669_v36 }
 0x436   :  { %v1684_v2 = vadd.f32 %v2969_v24, %v3733_v25  ;;  %v1678_v15 = vpop.f32.mrb[47].mxu1 }
 0x437   :  { %v1679_v30 = vadd.f32 %v1678_v15, %v3724_v51 }
 0x438   :  { %1841 = vadd.xlane.f32.xlu1 %v1684_v2 }
 0x439   :  { %v2972_v20 = vpop.f32.mrb[48].mxu1  ;;  %1839 = vadd.xlane.f32.xlu0 %v1679_v30 }
 0x43a   :  { %v1694_v33 = vadd.f32 %v2972_v20, %v3751_v10  ;;  %v1688_v9 = vpop.f32.mrb[49].mxu1 }
 0x43b   :  { %v1689_v13 = vadd.f32 %v1688_v9, %v3742_v41 }
 0x43c   :  { %1845 = vadd.xlane.f32.xlu1 %v1694_v33 }
 0x43d   :  { %1843 = vadd.xlane.f32.xlu0 %v1689_v13 }
 0x4b9   :  { %v1830_v46 = vpop.xlane.xlu1 %1829 }
 0x4ba   :  { %v1848_v35 = vmul.f32 0.0078125, %v1830_v46  ;;  %v1828_v5 = vpop.xlane.xlu0 %1827 }
 0x4bb   :  { %v1847_v6 = vmul.f32 0.0078125, %v1828_v5 }
 0x4bc   :  { %v4256_v42 = vsub.f32 %v1654_v52, %v1848_v35 }
 0x4bd   :  { %v4258_v25 = vsub.f32 %v1649_v0, %v1847_v6  ;;  %v1834_v24 = vpop.xlane.xlu1 %1833 }
 0x4be   :  { %v1850_v51 = vmul.f32 0.0078125, %v1834_v24  ;;  %v1832_v15 = vpop.xlane.xlu0 %1831  ;;  %v1868_v19 = vmul.f32 %v4256_v42, %v4256_v42 }
 0x4bf   :  { %v1849_v10 = vmul.f32 0.0078125, %v1832_v15  ;;  %v1867_v41 = vmul.f32 %v4258_v25, %v4258_v25 }
 0x4c0   :  { %1879 = vadd.xlane.f32.xlu1 %v1868_v19  ;;  %v4264_v20 = vsub.f32 %v1664_v61, %v1850_v51 }
 0x4c1   :  { %v4266_v9 = vsub.f32 %v1659_v17, %v1849_v10  ;;  %v1838_v46 = vpop.xlane.xlu1 %1837  ;;  %1877 = vadd.xlane.f32.xlu0 %v1867_v41 }
 0x4c2   :  { %v1852_v52 = vmul.f32 0.0078125, %v1838_v46  ;;  %v1836_v0 = vpop.xlane.xlu0 %1835  ;;  %v1870_v35 = vmul.f32 %v4264_v20, %v4264_v20 }
 0x4c3   :  { %v1851_v5 = vmul.f32 0.0078125, %v1836_v0  ;;  %v1869_v6 = vmul.f32 %v4266_v9, %v4266_v9 }
 0x4c4   :  { %v4272_v24 = vsub.f32 %v1674_v8, %v1852_v52  ;;  %1883 = vadd.xlane.f32.xlu1 %v1870_v35 }
 0x4c5   :  { %v4274_v15 = vsub.f32 %v1669_v36, %v1851_v5  ;;  %v1842_v61 = vpop.xlane.xlu1 %1841  ;;  %1881 = vadd.xlane.f32.xlu0 %v1869_v6 }
 0x4c6   :  { %v1854_v19 = vmul.f32 0.0078125, %v1842_v61  ;;  %v1840_v17 = vpop.xlane.xlu0 %1839  ;;  %v1872_v51 = vmul.f32 %v4272_v24, %v4272_v24 }
 0x4c7   :  { %v1853_v10 = vmul.f32 0.0078125, %v1840_v17  ;;  %v1871_v41 = vmul.f32 %v4274_v15, %v4274_v15 }
 0x4c8   :  { %v4280_v46 = vsub.f32 %v1684_v2, %v1854_v19  ;;  %1887 = vadd.xlane.f32.xlu1 %v1872_v51  ;;  %v104_v51 = vld [vmem:[%s5127_s4] sm:$0xff] }
 0x4c9   :  { %v4282_v0 = vsub.f32 %v1679_v30, %v1853_v10  ;;  %v1846_v8 = vpop.xlane.xlu1 %1845  ;;  %1885 = vadd.xlane.f32.xlu0 %v1871_v41  ;;  %v105_v30 = vld [vmem:[%s5127_s4 + $0x8] sm:$0xff]  ;;  %v107_v10 = vld [vmem:[%s5127_s4 + $0x18] sm:$0xff]  ;;  %v106_v41 = vld [vmem:[%s5127_s4 + $0x10] sm:$0xff]  ;;  %v4370_v47 = vadd.f32 %v4168_v31, %v104_v51 }
 0x4ca   :  { %v1856_v36 = vmul.f32 0.0078125, %v1846_v8  ;;  %v1844_v52 = vpop.xlane.xlu0 %1843  ;;  %v1874_v35 = vmul.f32 %v4280_v46, %v4280_v46  ;;  %v4317_v8 = vadd.f32 %v3656_v62, %v107_v10  ;;  %v5197_v62 = vld [vmem:[#allocation3_spill] sm:$0xff] }
 0x4cb   :  { %v1855_v5 = vmul.f32 0.0078125, %v1844_v52  ;;  %v1873_v6 = vmul.f32 %v4282_v0, %v4282_v0  ;;  %v5196_v52 = vld [vmem:[#allocation2_spill] sm:$0xff] }
 0x4cc   :  { %v4288_v61 = vsub.f32 %v1694_v33, %v1856_v36  ;;  %1891 = vadd.xlane.f32.xlu1 %v1874_v35  ;;  %v4303_v33 = vadd.f32 %v3652_v59, %v105_v30  ;;  %v4320_v59 = vadd.f32 %v3658_v63, %v106_v41  ;;  %v108_v36 = vld [vmem:[%s5127_s4 + $0x20] sm:$0xff]  ;;  %v111_v63 = vld [vmem:[%s5127_s4 + $0x38] sm:$0xff] }
 0x4cd   :  { %v4290_v17 = vsub.f32 %v1689_v13, %v1855_v5  ;;  %1889 = vadd.xlane.f32.xlu0 %v1873_v6  ;;  %v4306_v13 = vadd.f32 %v3654_v60, %v104_v51  ;;  %v109_v60 = vld [vmem:[%s5127_s4 + $0x28] sm:$0xff]  ;;  %v4334_v5 = vadd.f32 %v5197_v62, %v108_v36  ;;  %v110_v6 = vld [vmem:[%s5127_s4 + $0x30] sm:$0xff]  ;;  %v4386_v31 = vadd.f32 %v4176_v45, %v108_v36 }
 0x4ce   :  { %v1876_v2 = vmul.f32 %v4288_v61, %v4288_v61  ;;  %v4331_v35 = vadd.f32 %v5196_v52, %v109_v60  ;;  %v5199_v52 = vld [vmem:[#allocation5_spill] sm:$0xff]  ;;  %v113_v62 = vld [vmem:[%s5127_s4 + $0x48] sm:$0xff]  ;;  %v4402_v45 = vadd.f32 %v4184_v54, %v112_v14 }
 0x4cf   :  { %v1875_v19 = vmul.f32 %v4290_v17, %v4290_v17  ;;  %v4348_v58 = vadd.f32 %v5199_v52, %v110_v6  ;;  %v4359_v34 = vadd.f32 %v5200_v4, %v113_v62  ;;  %v4367_v52 = vadd.f32 %v4166_v37, %v105_v30 }
 0x4d0   :  { %1895 = vadd.xlane.f32.xlu1 %v1876_v2  ;;  %v5198_v2 = vld [vmem:[#allocation4_spill] sm:$0xff]  ;;  %v4375_v4 = vadd.f32 %v4170_v44, %v107_v10  ;;  %v4383_v37 = vadd.f32 %v4174_v48, %v109_v60  ;;  %v4391_v44 = vadd.f32 %v4178_v53, %v111_v63  ;;  %v4399_v48 = vadd.f32 %v4182_v56, %v113_v62 }
 0x4d1   :  { %1893 = vadd.xlane.f32.xlu0 %v1875_v19  ;;  %v4345_v19 = vadd.f32 %v5198_v2, %v111_v63  ;;  %v5201_v2 = vld [vmem:[#allocation7_spill] sm:$0xff]  ;;  %5205 = vst [vmem:[#allocation5_spill] sm:$0xff] %v4402_v45 }
 0x4d2   :  { %v4362_v29 = vadd.f32 %v5201_v2, %v112_v14  ;;  %v4378_v2 = vadd.f32 %v4172_v38, %v106_v41  ;;  %5202 = vst [vmem:[#allocation2_spill] sm:$0xff] %v4383_v37  ;;  %5203 = vst [vmem:[#allocation3_spill] sm:$0xff] %v4391_v44  ;;  %v4394_v38 = vadd.f32 %v4180_v49, %v110_v6 }
 0x4d3   :  { %5204 = vst [vmem:[#allocation4_spill] sm:$0xff] %v4399_v48 }
 0x4d4   :  { %599 = vadd.xlane.f32.xlu1 %v4303_v33 }
 0x4d5   :  { %597 = vadd.xlane.f32.xlu0 %v4306_v13 }
 0x4d8   :  { %603 = vadd.xlane.f32.xlu1 %v4317_v8 }
 0x4d9   :  { %601 = vadd.xlane.f32.xlu0 %v4320_v59 }
 0x4dc   :  { %607 = vadd.xlane.f32.xlu1 %v4331_v35 }
 0x4dd   :  { %605 = vadd.xlane.f32.xlu0 %v4334_v5 }
 0x4e0   :  { %611 = vadd.xlane.f32.xlu1 %v4345_v19 }
 0x4e1   :  { %609 = vadd.xlane.f32.xlu0 %v4348_v58 }
 0x4e4   :  { %615 = vadd.xlane.f32.xlu1 %v4359_v34 }
 0x4e5   :  { %613 = vadd.xlane.f32.xlu0 %v4362_v29 }
 0x4e8   :  { %1699 = vadd.xlane.f32.xlu1 %v4367_v52 }
 0x4e9   :  { %1697 = vadd.xlane.f32.xlu0 %v4370_v47 }
 0x4ec   :  { %1703 = vadd.xlane.f32.xlu1 %v4375_v4 }
 0x4ed   :  { %1701 = vadd.xlane.f32.xlu0 %v4378_v2 }
 0x4f0   :  { %1707 = vadd.xlane.f32.xlu1 %v4383_v37 }
 0x4f1   :  { %1705 = vadd.xlane.f32.xlu0 %v4386_v31 }
 0x4f4   :  { %1711 = vadd.xlane.f32.xlu1 %v4391_v44 }
 0x4f5   :  { %1709 = vadd.xlane.f32.xlu0 %v4394_v38 }
 0x4f8   :  { %1715 = vadd.xlane.f32.xlu1 %v4399_v48 }
 0x4f9   :  { %1713 = vadd.xlane.f32.xlu0 %v4402_v45 }
 0x54d   :  { %v1880_v30 = vpop.xlane.xlu1 %1879 }
 0x54e   :  { %v1898_v53 = vmul.f32 0.0078125, %v1880_v30  ;;  %v1878_v51 = vpop.xlane.xlu0 %1877 }
 0x54f   :  { %v1897_v10 = vmul.f32 0.0078125, %v1878_v51 }
 0x550   :  { %v1908_v49 = vadd.f32 1e-05, %v1898_v53 }
 0x551   :  { %v1907_v41 = vadd.f32 1e-05, %v1897_v10  ;;  %v1884_v60 = vpop.xlane.xlu1 %1883 }
 0x552   :  { %3246 = vrsqrt.f32 %v1908_v49  ;;  %v1900_v36 = vmul.f32 0.0078125, %v1884_v60  ;;  %v1882_v63 = vpop.xlane.xlu0 %1881 }
 0x553   :  { %3248 = vrsqrt.f32 %v1907_v41  ;;  %v1899_v56 = vmul.f32 0.0078125, %v1882_v63 }
 0x554   :  { %v1910_v6 = vadd.f32 1e-05, %v1900_v36 }
 0x555   :  { %v1909_v62 = vadd.f32 1e-05, %v1899_v56  ;;  %v1888_v14 = vpop.xlane.xlu1 %1887 }
 0x556   :  { %3250 = vrsqrt.f32 %v1910_v6  ;;  %v1902_v54 = vmul.f32 0.0078125, %v1888_v14  ;;  %v1886_v48 = vpop.xlane.xlu0 %1885 }
 0x557   :  { %3252 = vrsqrt.f32 %v1909_v62  ;;  %v1901_v44 = vmul.f32 0.0078125, %v1886_v48 }
 0x558   :  { %v1912_v45 = vadd.f32 1e-05, %v1902_v54 }
 0x559   :  { %v1911_v30 = vadd.f32 1e-05, %v1901_v44  ;;  %v1892_v37 = vpop.xlane.xlu1 %1891 }
 0x55a   :  { %3254 = vrsqrt.f32 %v1912_v45  ;;  %v1904_v53 = vmul.f32 0.0078125, %v1892_v37  ;;  %v1890_v51 = vpop.xlane.xlu0 %1889 }
 0x55b   :  { %3256 = vrsqrt.f32 %v1911_v30  ;;  %v1903_v10 = vmul.f32 0.0078125, %v1890_v51 }
 0x55c   :  { %v3247_v49 = vpop.eup %3246  ;;  %v1914_v60 = vadd.f32 1e-05, %v1904_v53 }
 0x55d   :  { %v3249_v41 = vpop.eup %3248  ;;  %v1928_v36 = vmul.f32 %v3247_v49, %v4256_v42  ;;  %v1913_v63 = vadd.f32 1e-05, %v1903_v10  ;;  %v1896_v56 = vpop.xlane.xlu1 %1895 }
 0x55e   :  { %v1927_v6 = vmul.f32 %v3249_v41, %v4258_v25  ;;  %3258 = vrsqrt.f32 %v1914_v60  ;;  %v1906_v62 = vmul.f32 0.0078125, %v1896_v56  ;;  %v1894_v48 = vpop.xlane.xlu0 %1893 }
 0x55f   :  { %3260 = vrsqrt.f32 %v1913_v63  ;;  %v1905_v44 = vmul.f32 0.0078125, %v1894_v48  ;;  %v1938_v45 = vmul.f32 %v1928_v36, %v3906_v40 }
 0x560   :  { %v3251_v37 = vpop.eup %3250  ;;  %v1916_v14 = vadd.f32 1e-05, %v1906_v62  ;;  %v1937_v54 = vmul.f32 %v1927_v6, %v3906_v40 }
 0x561   :  { %v3253_v30 = vpop.eup %3252  ;;  %v1930_v53 = vmul.f32 %v3251_v37, %v4264_v20  ;;  %v1915_v51 = vadd.f32 1e-05, %v1905_v44  ;;  %v600_v42 = vpop.xlane.xlu1 %599  ;;  %v1948_v10 = vadd.f32 %v1938_v45, %v3908_v1 }
 0x562   :  { %v1929_v25 = vmul.f32 %v3253_v30, %v4266_v9  ;;  %3262 = vrsqrt.f32 %v1916_v14  ;;  %v618_v49 = vmul.f32 0.0078125, %v600_v42  ;;  %v598_v60 = vpop.xlane.xlu0 %597  ;;  %v1947_v41 = vadd.f32 %v1937_v54, %v3908_v1 }
 0x563   :  { %3264 = vrsqrt.f32 %v1915_v51  ;;  %v617_v36 = vmul.f32 0.0078125, %v598_v60  ;;  %v1940_v63 = vmul.f32 %v1930_v53, %v3906_v40 }
 0x564   :  { %v3255_v56 = vpop.eup %3254  ;;  %v4416_v6 = vsub.f32 %v4303_v33, %v618_v49  ;;  %v3194_v20 = vpack.c.bf16 %v1948_v10, %v1947_v41  ;;  %v1939_v62 = vmul.f32 %v1929_v25, %v3906_v40 }
 0x565   :  { %v3257_v48 = vpop.eup %3256  ;;  %v1932_v44 = vmul.f32 %v3255_v56, %v4272_v24  ;;  %v4421_v9 = vsub.f32 %v4306_v13, %v617_v36  ;;  %v604_v45 = vpop.xlane.xlu1 %603  ;;  %v1950_v37 = vadd.f32 %v1940_v63, %v3908_v1 }
 0x566   :  { %v1931_v14 = vmul.f32 %v3257_v48, %v4274_v15  ;;  %v620_v54 = vmul.f32 0.0078125, %v604_v45  ;;  %3195 = vmatprep.subr.bf16.mxu0 %v3194_v20  ;;  %3214 = vmatprep.subr.bf16.mxu1 %v3194_v20  ;;  %v602_v30 = vpop.xlane.xlu0 %601  ;;  %v638_v33 = vmul.f32 %v4416_v6, %v4416_v6  ;;  %v1949_v53 = vadd.f32 %v1939_v62, %v3908_v1 }
 0x567   :  { %v619_v51 = vmul.f32 0.0078125, %v602_v30  ;;  %3197 = vmatpush3.bf16.msra.mxu0 %v3194_v20  ;;  %3219 = vmatpush3.bf16.msra.mxu1 %v3194_v20  ;;  %v637_v24 = vmul.f32 %v4421_v9, %v4421_v9  ;;  %v1942_v13 = vmul.f32 %v1932_v44, %v3906_v40 }
 0x568   :  { %v3259_v42 = vpop.eup %3258  ;;  %v4432_v15 = vsub.f32 %v4317_v8, %v620_v54  ;;  %649 = vadd.xlane.f32.xlu1 %v638_v33  ;;  %v3198_v10 = vpack.c.bf16 %v1950_v37, %v1949_v53  ;;  %v1941_v25 = vmul.f32 %v1931_v14, %v3906_v40 }
 0x569   :  { %v3261_v49 = vpop.eup %3260  ;;  %v1934_v60 = vmul.f32 %v3259_v42, %v4280_v46  ;;  %v4437_v41 = vsub.f32 %v4320_v59, %v619_v51  ;;  %v608_v36 = vpop.xlane.xlu1 %607  ;;  %647 = vadd.xlane.f32.xlu0 %v637_v24  ;;  %v1952_v63 = vadd.f32 %v1942_v13, %v3908_v1 }
 0x56a   :  { %v1933_v56 = vmul.f32 %v3261_v49, %v4282_v0  ;;  %v622_v20 = vmul.f32 0.0078125, %v608_v36  ;;  %3199 = vmatprep.subr.bf16.mxu0 %v3198_v10  ;;  %3215 = vmatprep.subr.bf16.mxu1 %v3198_v10  ;;  %v606_v8 = vpop.xlane.xlu0 %605  ;;  %v640_v62 = vmul.f32 %v4432_v15, %v4432_v15  ;;  %v1951_v48 = vadd.f32 %v1941_v25, %v3908_v1 }
 0x56b   :  { %v621_v44 = vmul.f32 0.0078125, %v606_v8  ;;  %3201 = vmatpush3.bf16.msra.mxu0 %v3198_v10  ;;  %3220 = vmatpush3.bf16.msra.mxu1 %v3198_v10  ;;  %v639_v46 = vmul.f32 %v4437_v41, %v4437_v41  ;;  %v1944_v59 = vmul.f32 %v1934_v60, %v3906_v40 }
 0x56c   :  { %v3263_v45 = vpop.eup %3262  ;;  %v4448_v0 = vsub.f32 %v4331_v35, %v622_v20  ;;  %653 = vadd.xlane.f32.xlu1 %v640_v62  ;;  %v3202_v37 = vpack.c.bf16 %v1952_v63, %v1951_v48  ;;  %v1943_v14 = vmul.f32 %v1933_v56, %v3906_v40 }
 0x56d   :  { %v3265_v54 = vpop.eup %3264  ;;  %v1936_v30 = vmul.f32 %v3263_v45, %v4288_v61  ;;  %v4453_v33 = vsub.f32 %v4334_v5, %v621_v44  ;;  %v612_v53 = vpop.xlane.xlu1 %611  ;;  %651 = vadd.xlane.f32.xlu0 %v639_v46  ;;  %v1954_v51 = vadd.f32 %v1944_v59, %v3908_v1  ;;  %v5226_v45 = vld [vmem:[#allocation40_spill] sm:$0xff] }
 0x56e   :  { %v1935_v24 = vmul.f32 %v3265_v54, %v4290_v17  ;;  %v624_v13 = vmul.f32 0.0078125, %v612_v53  ;;  %3203 = vmatprep.subr.bf16.mxu0 %v3202_v37  ;;  %3216 = vmatprep.subr.bf16.mxu1 %v3202_v37  ;;  %v610_v35 = vpop.xlane.xlu0 %609  ;;  %v642_v42 = vmul.f32 %v4448_v0, %v4448_v0  ;;  %v1953_v10 = vadd.f32 %v1943_v14, %v3908_v1 }
 0x56f   :  { %v623_v25 = vmul.f32 0.0078125, %v610_v35  ;;  %3205 = vmatpush3.bf16.msra.mxu0 %v3202_v37  ;;  %3221 = vmatpush3.bf16.msra.mxu1 %v3202_v37  ;;  %v641_v61 = vmul.f32 %v4453_v33, %v4453_v33  ;;  %v1946_v5 = vmul.f32 %v1936_v30, %v3906_v40 }
 0x570   :  { %v4464_v49 = vsub.f32 %v4345_v19, %v624_v13  ;;  %657 = vadd.xlane.f32.xlu1 %v642_v42  ;;  %v3206_v17 = vpack.c.bf16 %v1954_v51, %v1953_v10  ;;  %v1945_v60 = vmul.f32 %v1935_v24, %v3906_v40 }
 0x571   :  { %v4468_v36 = vsub.f32 %v4348_v58, %v623_v25  ;;  %v616_v63 = vpop.xlane.xlu1 %615  ;;  %655 = vadd.xlane.f32.xlu0 %v641_v61  ;;  %v1956_v56 = vadd.f32 %v1946_v5, %v3908_v1 }
 0x572   :  { %v626_v20 = vmul.f32 0.0078125, %v616_v63  ;;  %3207 = vmatprep.subr.bf16.mxu0 %v3206_v17  ;;  %3217 = vmatprep.subr.bf16.mxu1 %v3206_v17  ;;  %v614_v8 = vpop.xlane.xlu0 %613  ;;  %v644_v62 = vmul.f32 %v4464_v49, %v4464_v49  ;;  %v1955_v19 = vadd.f32 %v1945_v60, %v3908_v1 }
 0x573   :  { %v625_v48 = vmul.f32 0.0078125, %v614_v8  ;;  %3209 = vmatpush3.bf16.msra.mxu0 %v3206_v17  ;;  %3222 = vmatpush3.bf16.msra.mxu1 %v3206_v17  ;;  %v643_v40 = vmul.f32 %v4468_v36, %v4468_v36 }
 0x574   :  { %v4477_v58 = vsub.f32 %v4359_v34, %v626_v20  ;;  %661 = vadd.xlane.f32.xlu1 %v644_v62  ;;  %v3210_v44 = vpack.c.bf16 %v1956_v56, %v1955_v19  ;;  %v5215_v34 = vld [vmem:[#allocation12_spill] sm:$0xff] }
 0x575   :  { %v4480_v46 = vsub.f32 %v4362_v29, %v625_v48  ;;  %659 = vadd.xlane.f32.xlu0 %v643_v40  ;;  %v5224_v29 = vld [vmem:[#allocation28_spill] sm:$0xff]  ;;  %v1700_v14 = vpop.xlane.xlu1 %1699  ;;  %v5227_v40 = vld [vmem:[#allocation2_spill] sm:$0xff] }
 0x576   :  { %3211 = vmatprep.subr.bf16.mxu0 %v3210_v44  ;;  %3218 = vmatprep.subr.bf16.mxu1 %v3210_v44  ;;  %v646_v1 = vmul.f32 %v4477_v58, %v4477_v58  ;;  %v1698_v37 = vpop.xlane.xlu0 %1697  ;;  %v1718_v53 = vmul.f32 0.0078125, %v1700_v14 }
 0x577   :  { %3213 = vmatpush3.bf16.msra.mxu0 %v3210_v44  ;;  %3223 = vmatpush3.bf16.msra.mxu1 %v3210_v44  ;;  %v645_v59 = vmul.f32 %v4480_v46, %v4480_v46  ;;  %v1717_v24 = vmul.f32 0.0078125, %v1698_v37 }
 0x578   :  { %665 = vadd.xlane.f32.xlu1 %v646_v1  ;;  %v4565_v13 = vsub.f32 %v4367_v52, %v1718_v53 }
 0x579   :  { %663 = vadd.xlane.f32.xlu0 %v645_v59  ;;  %v1704_v30 = vpop.xlane.xlu1 %1703  ;;  %v4568_v25 = vsub.f32 %v4370_v47, %v1717_v24 }
 0x57a   :  { %2994 = vmatmul.mubr.msk.f32.vlgmr.msra.gmra.mrb[60].mxu0 %vm873_vm1, %v3942_v16  ;;  %3021 = vmatmul.mubr.msk.f32.vlgmr.msra.gmra.mrb[50].mxu1 %vm873_vm1, %v4081_v50  ;;  %v5206_v16 = vld [vmem:[#allocation17_spill] sm:$0xff]  ;;  %v5216_v50 = vld [vmem:[#allocation24_spill] sm:$0xff]  ;;  %v1702_v54 = vpop.xlane.xlu0 %1701  ;;  %v1720_v5 = vmul.f32 0.0078125, %v1704_v30  ;;  %v1738_v60 = vmul.f32 %v4565_v13, %v4565_v13 }
 0x57b   :  { %3023 = vmatprep.mubr.msk.f32.mxu1 %vm873_vm1, %v4086_v57  ;;  %2996 = vmatprep.mubr.msk.f32.mxu0 %vm873_vm1, %v3948_v28  ;;  %v5207_v28 = vld [vmem:[#allocation18_spill] sm:$0xff]  ;;  %v5217_v57 = vld [vmem:[#allocation13_spill] sm:$0xff]  ;;  %v1719_v35 = vmul.f32 0.0078125, %v1702_v54  ;;  %v1737_v20 = vmul.f32 %v4568_v25, %v4568_v25 }
 0x57c   :  { %v4581_v47 = vsub.f32 %v4375_v4, %v1720_v5 }
 0x57d   :  { %v1708_v42 = vpop.xlane.xlu1 %1707  ;;  %v4571_v17 = vsub.f32 %v4378_v2, %v1719_v35 }
 0x57e   :  { %3024 = vmatmul.mubr.msk.f32.gmra.mrb[52].mxu1 %vm873_vm1, %v4095_v11  ;;  %2997 = vmatmul.mubr.msk.f32.gmra.mrb[62].mxu0 %vm873_vm1, %v3958_v43  ;;  %v5208_v43 = vld [vmem:[#allocation9_spill] sm:$0xff]  ;;  %v5218_v11 = vld [vmem:[#allocation23_spill] sm:$0xff]  ;;  %v1706_v51 = vpop.xlane.xlu0 %1705  ;;  %v1722_v8 = vmul.f32 0.0078125, %v1708_v42  ;;  %v1740_v4 = vmul.f32 %v4581_v47, %v4581_v47 }
 0x57f   :  { %2999 = vmatprep.mubr.msk.f32.mxu0 %vm873_vm1, %v3963_v12  ;;  %3026 = vmatprep.mubr.msk.f32.mxu1 %vm873_vm1, %v4100_v55  ;;  %v5209_v12 = vld [vmem:[#allocation22_spill] sm:$0xff]  ;;  %v1721_v61 = vmul.f32 0.0078125, %v1706_v51  ;;  %v1739_v2 = vmul.f32 %v4571_v17, %v4571_v17 }
 0x580   :  { %v5219_v55 = vld [vmem:[#allocation14_spill] sm:$0xff]  ;;  %v4591_v44 = vsub.f32 %v5227_v40, %v1722_v8 }
 0x581   :  { %v4576_v63 = vsub.f32 %v4386_v31, %v1721_v61  ;;  %v1712_v52 = vpop.xlane.xlu1 %1711 }
 0x582   :  { %3000 = vmatmul.mubr.msk.f32.gmra.mrb[64].mxu0 %vm873_vm1, %v3973_v18  ;;  %3027 = vmatmul.mubr.msk.f32.gmra.mrb[54].mxu1 %vm873_vm1, %v4109_v7  ;;  %v5210_v18 = vld [vmem:[#allocation19_spill] sm:$0xff]  ;;  %v5220_v7 = vld [vmem:[#allocation26_spill] sm:$0xff]  ;;  %v1710_v10 = vpop.xlane.xlu0 %1709  ;;  %v1724_v1 = vmul.f32 0.0078125, %v1712_v52 }
 0x583   :  { %3002 = vmatprep.mubr.msk.f32.mxu0 %vm873_vm1, %v3979_v39  ;;  %3029 = vmatprep.mubr.msk.f32.mxu1 %vm873_vm1, %v4114_v27  ;;  %v5211_v39 = vld [vmem:[#allocation10_spill] sm:$0xff]  ;;  %v5221_v27 = vld [vmem:[#allocation15_spill] sm:$0xff]  ;;  %v1723_v56 = vmul.f32 0.0078125, %v1710_v10  ;;  %v1741_v48 = vmul.f32 %v4576_v63, %v4576_v63 }
 0x585   :  { %v4586_v19 = vsub.f32 %v4394_v38, %v1723_v56  ;;  %v1716_v59 = vpop.xlane.xlu1 %1715 }
 0x586   :  { %3003 = vmatmul.mubr.msk.f32.gmra.mrb[66].mxu0 %vm873_vm1, %v3989_v21  ;;  %3030 = vmatmul.mubr.msk.f32.gmra.mrb[56].mxu1 %vm873_vm1, %v4123_v22  ;;  %v5212_v21 = vld [vmem:[#allocation20_spill] sm:$0xff]  ;;  %v5222_v22 = vld [vmem:[#allocation25_spill] sm:$0xff]  ;;  %v1714_v62 = vpop.xlane.xlu0 %1713 }
 0x587   :  { %3005 = vmatprep.mubr.msk.f32.mxu0 %vm873_vm1, %v3995_v26  ;;  %3032 = vmatprep.mubr.msk.f32.mxu1 %vm873_vm1, %v4128_v3  ;;  %v5213_v26 = vld [vmem:[#allocation11_spill] sm:$0xff]  ;;  %v5223_v3 = vld [vmem:[#allocation16_spill] sm:$0xff]  ;;  %v1725_v31 = vmul.f32 0.0078125, %v1714_v62  ;;  %v1743_v38 = vmul.f32 %v4586_v19, %v4586_v19 }
 0x589   :  { %1181 = vrot.lane.b32.xlu1 %v4186_v32, %s3307_s0  ;;  %v5225_v32 = vld [vmem:[#allocation27_spill] sm:$0xff] }
 0x58a   :  { %3006 = vmatmul.mubr.msk.f32.gmra.mrb[68].mxu0 %vm873_vm1, %v4005_v23  ;;  %3033 = vmatmul.mubr.msk.f32.gmra.mrb[58].mxu1 %vm873_vm1, %v5206_v16  ;;  %v5214_v23 = vld [vmem:[#allocation21_spill] sm:$0xff] }
 0x58b   :  { %3035 = vmatprep.mubr.msk.f32.mxu1 %vm873_vm1, %v5207_v28  ;;  %3008 = vmatprep.mubr.msk.f32.mxu0 %vm873_vm1, %v5208_v43  ;;  %v5228_v16 = vld [vmem:[#allocation5_spill] sm:$0xff]  ;;  %v5229_v43 = vld [vmem:[#allocation3_spill] sm:$0xff] }
 0x58c   :  { %v4596_v28 = vsub.f32 %v5228_v16, %v1725_v31 }
 0x58d   :  { %1183 = vrot.lane.b32.xlu1 %v5209_v12, %s3307_s0  ;;  %v4601_v12 = vsub.f32 %v5229_v43, %v1724_v1 }
 0x58e   :  { %3036 = vmatmul.mubr.msk.f32.gmra.mrb[60].mxu1 %vm873_vm1, %v5210_v18  ;;  %3009 = vmatmul.mubr.msk.f32.gmra.mrb[70].mxu0 %vm873_vm1, %v5211_v39  ;;  %v1726_v18 = vmul.f32 0.0078125, %v1716_v59  ;;  %v1742_v39 = vmul.f32 %v4591_v44, %v4591_v44  ;;  %v5241_v59 = vlaneseq }
 0x58f   :  { %1179 = vrot.lane.b32.xlu0 %v5212_v21, %s3307_s0  ;;  %3011 = vmatprep.mubr.msk.f32.mxu0 %vm873_vm1, %v5213_v26  ;;  %v1745_v21 = vmul.f32 %v4596_v28, %v4596_v28  ;;  %v5230_v26 = vld [vmem:[#allocation4_spill] sm:$0xff] }
 0x590   :  { %v4635_v16 = vand.u32 127, %v5241_v59 }
 0x591   :  { %1185 = vrot.lane.b32.xlu1 %v5214_v23, %s3307_s0  ;;  %v4608_v23 = vsub.f32 %v5230_v26, %v1726_v18 }
 0x592   :  { %3012 = vmatmul.mubr.msk.f32.gmra.mrb[72].mxu0 %vm873_vm1, %v5215_v34  ;;  %v1744_v34 = vmul.f32 %v4601_v12, %v4601_v12  ;;  %vm137_vm2 = vcmp.eq.s32.totalorder %v4635_v16, 0  ;;  %vm138_vm3 = vcmp.eq.s32.totalorder %v4635_v16, 127 }
 0x593   :  { %1187 = vrot.lane.b32.xlu0 %v5216_v50, %s3307_s0  ;;  %3014 = vmatprep.mubr.msk.f32.mxu0 %vm873_vm1, %v5217_v57  ;;  %v1746_v50 = vmul.f32 %v4608_v23, %v4608_v23  ;;  %v5231_v57 = vld [vmem:[#allocation39_spill] sm:$0xff] }
 0x595   :  { %1189 = vrot.lane.b32.xlu1 %v5218_v11, %s3307_s0  ;;  %v5232_v11 = vld [vmem:[#allocation41_spill] sm:$0xff] }
 0x596   :  { %3015 = vmatmul.mubr.msk.f32.gmra.mrb[74].mxu0 %vm873_vm1, %v5219_v55  ;;  %v5233_v55 = vld [vmem:[#allocation43_spill] sm:$0xff] }
 0x597   :  { %1191 = vrot.lane.b32.xlu0 %v5220_v7, %s3307_s0  ;;  %3017 = vmatprep.mubr.msk.f32.mxu0 %vm873_vm1, %v5221_v27  ;;  %v5234_v7 = vld [vmem:[#allocation42_spill] sm:$0xff]  ;;  %v5235_v27 = vld [vmem:[#allocation45_spill] sm:$0xff] }
 0x599   :  { %1193 = vrot.lane.b32.xlu1 %v5222_v22, %s3307_s0  ;;  %v5236_v22 = vld [vmem:[#allocation44_spill] sm:$0xff] }
 0x59a   :  { %3018 = vmatmul.mubr.msk.f32.gmra.mrb[76].mxu0 %vm873_vm1, %v5223_v3  ;;  %v5237_v3 = vld [vmem:[#allocation47_spill] sm:$0xff] }
 0x59b   :  { %1195 = vrot.lane.b32.xlu0 %v5224_v29, %s3307_s0  ;;  %v5238_v29 = vld [vmem:[#allocation46_spill] sm:$0xff] }
 0x59d   :  { %1197 = vrot.lane.b32.xlu1 %v5225_v32, %s3307_s0  ;;  %v5239_v32 = vld [vmem:[#allocation48_spill] sm:$0xff] }
 0x59f   :  { %1209 = vrot.lane.b32.xlu0 %v5226_v45, %s3308_s30 }
 0x5be   :  { %1749 = vadd.xlane.f32.xlu0 %v1738_v60 }
 0x5c1   :  { %1747 = vadd.xlane.f32.xlu1 %v1737_v20  ;;  %v5240_v20 = vld [vmem:[#allocation8_spill] sm:$0xff] }
 0x5c2   :  { %1751 = vadd.xlane.f32.xlu0 %v1739_v2  ;;  %v709_v8 = vsub.s32 0, %v5240_v20 }
 0x5c5   :  { %1755 = vadd.xlane.f32.xlu1 %v1741_v48  ;;  %v723_v48 = vsub.s32 1, %v5240_v20 }
 0x5c6   :  { %1753 = vadd.xlane.f32.xlu0 %v1740_v4 }
 0x5c9   :  { %1759 = vadd.xlane.f32.xlu1 %v1743_v38  ;;  %v3306_v38 = vld [vmem:[%s5127_s4 + $0xf0] sm:$0xff] }
 0x5ca   :  { %1757 = vadd.xlane.f32.xlu0 %v1742_v39  ;;  %v4640_v43 = vrot.slane %v3306_v38, %v709_v8 }
 0x5cd   :  { %1763 = vadd.xlane.f32.xlu1 %v1745_v21 }
 0x5ce   :  { %1761 = vadd.xlane.f32.xlu0 %v1744_v34 }
 0x5d2   :  { %1765 = vadd.xlane.f32.xlu0 %v1746_v50 }
 0x5de   :  { %1211 = vrot.lane.b32.xlu1 %v5231_v57, %s3308_s30  ;;  %v4643_v57 = vrot.slane %v3306_v38, %v723_v48 }
 0x5e2   :  { %1215 = vrot.lane.b32.xlu1 %v5232_v11, %s3308_s30 }
 0x5e6   :  { %1219 = vrot.lane.b32.xlu1 %v5233_v55, %s3308_s30 }
 0x5e8   :  { %1213 = vrot.lane.b32.xlu0 %v5234_v7, %s3308_s30 }
 0x5ea   :  { %1223 = vrot.lane.b32.xlu1 %v5235_v27, %s3308_s30 }
 0x5ec   :  { %1217 = vrot.lane.b32.xlu0 %v5236_v22, %s3308_s30 }
 0x5ee   :  { %1227 = vrot.lane.b32.xlu1 %v5237_v3, %s3308_s30 }
 0x5f0   :  { %1221 = vrot.lane.b32.xlu0 %v5238_v29, %s3308_s30 }
 0x5f4   :  { %1225 = vrot.lane.b32.xlu0 %v5239_v32, %s3308_s30 }
 0x5f5   :  { %v650_v45 = vpop.xlane.xlu1 %649 }
 0x5f6   :  { %v668_v37 = vmul.f32 0.0078125, %v650_v45  ;;  %v648_v14 = vpop.xlane.xlu0 %647 }
 0x5f7   :  { %v667_v54 = vmul.f32 0.0078125, %v648_v14 }
 0x5f8   :  { %v678_v30 = vadd.f32 1e-05, %v668_v37 }
 0x5f9   :  { %v677_v53 = vadd.f32 1e-05, %v667_v54  ;;  %v654_v51 = vpop.xlane.xlu1 %653 }
 0x5fa   :  { %3266 = vrsqrt.f32 %v678_v30  ;;  %v670_v24 = vmul.f32 0.0078125, %v654_v51  ;;  %v652_v35 = vpop.xlane.xlu0 %651 }
 0x5fb   :  { %3268 = vrsqrt.f32 %v677_v53  ;;  %v669_v42 = vmul.f32 0.0078125, %v652_v35 }
 0x5fc   :  { %v680_v10 = vadd.f32 1e-05, %v670_v24 }
 0x5fd   :  { %v679_v61 = vadd.f32 1e-05, %v669_v42  ;;  %v658_v5 = vpop.xlane.xlu1 %657 }
 0x5fe   :  { %3270 = vrsqrt.f32 %v680_v10  ;;  %v672_v60 = vmul.f32 0.0078125, %v658_v5  ;;  %v656_v52 = vpop.xlane.xlu0 %655 }
 0x5ff   :  { %3272 = vrsqrt.f32 %v679_v61  ;;  %v671_v56 = vmul.f32 0.0078125, %v656_v52 }
 0x600   :  { %v682_v62 = vadd.f32 1e-05, %v672_v60  ;;  %v5242_v60 = vld [vmem:[#allocation29_spill] sm:$0xff] }
 0x601   :  { %v681_v2 = vadd.f32 1e-05, %v671_v56  ;;  %v662_v31 = vpop.xlane.xlu1 %661 }
 0x602   :  { %3274 = vrsqrt.f32 %v682_v62  ;;  %v674_v40 = vmul.f32 0.0078125, %v662_v31  ;;  %v660_v1 = vpop.xlane.xlu0 %659 }
 0x603   :  { %3276 = vrsqrt.f32 %v681_v2  ;;  %v673_v4 = vmul.f32 0.0078125, %v660_v1 }
 0x604   :  { %v3267_v18 = vpop.eup %3266  ;;  %v684_v39 = vadd.f32 1e-05, %v674_v40 }
 0x605   :  { %v3269_v21 = vpop.eup %3268  ;;  %v683_v26 = vadd.f32 1e-05, %v673_v4  ;;  %v666_v34 = vpop.xlane.xlu1 %665  ;;  %v698_v50 = vmul.f32 %v3267_v18, %v4416_v6 }
 0x606   :  { %3278 = vrsqrt.f32 %v684_v39  ;;  %v676_v11 = vmul.f32 0.0078125, %v666_v34  ;;  %v664_v55 = vpop.xlane.xlu0 %663  ;;  %v697_v7 = vmul.f32 %v3269_v21, %v4421_v9 }
 0x607   :  { %3280 = vrsqrt.f32 %v683_v26  ;;  %v675_v27 = vmul.f32 0.0078125, %v664_v55  ;;  %v712_v22 = vmul.f32 %v4640_v43, %v698_v50  ;;  %v5243_v26 = vld [vmem:[#allocation32_spill] sm:$0xff] }
 0x608   :  { %v3271_v3 = vpop.eup %3270  ;;  %v686_v29 = vadd.f32 1e-05, %v676_v11  ;;  %v711_v32 = vmul.f32 %v4640_v43, %v697_v7 }
 0x609   :  { %v3273_v45 = vpop.eup %3272  ;;  %v685_v37 = vadd.f32 1e-05, %v675_v27  ;;  %v726_v6 = vadd.f32 %v4643_v57, %v712_v22  ;;  %v1182_v14 = vpop.permute.xlu1 %1181  ;;  %v700_v54 = vmul.f32 %v3271_v3, %v4432_v15 }
 0x60a   :  { %3282 = vrsqrt.f32 %v686_v29  ;;  %v1200_v9 = vsel %vm137_vm2, 0.0, %v1182_v14  ;;  %v725_v30 = vadd.f32 %v4643_v57, %v711_v32  ;;  %v1180_v53 = vpop.permute.xlu0 %1179  ;;  %v699_v51 = vmul.f32 %v3273_v45, %v4437_v41  ;;  %v5244_v45 = vld [vmem:[#allocation31_spill] sm:$0xff] }
 0x60b   :  { %3284 = vrsqrt.f32 %v685_v37  ;;  %1290 = vst [vmem:[%s5129_s6 + $0x8] sm:$0xff] %v726_v6  ;;  %v1240_v24 = vadd.f32 %v1200_v9, %v726_v6  ;;  %v714_v35 = vmul.f32 %v4640_v43, %v700_v54  ;;  %v1199_v1 = vsel %vm137_vm2, 0.0, %v1180_v53  ;;  %v5245_v53 = vld [vmem:[#allocation34_spill] sm:$0xff] }
 0x60c   :  { %v3275_v42 = vpop.eup %3274  ;;  %1289 = vst [vmem:[%s5129_s6] sm:$0xff] %v725_v30  ;;  %v713_v15 = vmul.f32 %v4640_v43, %v699_v51  ;;  %v1239_v22 = vadd.f32 %v1199_v1, %v725_v30 }
 0x60d   :  { %v3277_v10 = vpop.eup %3276  ;;  %v1184_v61 = vpop.permute.xlu1 %1183  ;;  %v728_v5 = vadd.f32 %v4643_v57, %v714_v35  ;;  %v702_v41 = vmul.f32 %v3275_v42, %v4448_v0  ;;  %v4666_v52 = vadd.f32 %v5242_v60, %v1240_v24  ;;  %v5247_v60 = vld [vmem:[#allocation30_spill] sm:$0xff] }
 0x60e   :  { %v727_v56 = vadd.f32 %v4643_v57, %v713_v15  ;;  %v1201_v20 = vsel %vm137_vm2, 0.0, %v1184_v61  ;;  %v701_v8 = vmul.f32 %v3277_v10, %v4453_v33  ;;  %v1188_v62 = vpop.permute.xlu0 %1187  ;;  %v5246_v10 = vld [vmem:[#allocation33_spill] sm:$0xff] }
 0x60f   :  { %1292 = vst [vmem:[%s5129_s6 + $0x18] sm:$0xff] %v728_v5  ;;  %v716_v2 = vmul.f32 %v4640_v43, %v702_v41  ;;  %v1203_v50 = vsel %vm137_vm2, 0.0, %v1188_v62 }
 0x610   :  { %v3279_v31 = vpop.eup %3278  ;;  %v1241_v48 = vadd.f32 %v1201_v20, %v727_v56  ;;  %1291 = vst [vmem:[%s5129_s6 + $0x10] sm:$0xff] %v727_v56  ;;  %v715_v0 = vmul.f32 %v4640_v43, %v701_v8  ;;  %v1249_v56 = vadd.f32 %v1239_v22, %v5247_v60  ;;  %v5248_v8 = vld [vmem:[#allocation36_spill] sm:$0xff] }
 0x611   :  { %v3281_v40 = vpop.eup %3280  ;;  %v1186_v33 = vpop.permute.xlu1 %1185  ;;  %v730_v4 = vadd.f32 %v4643_v57, %v716_v2  ;;  %v704_v59 = vmul.f32 %v3279_v31, %v4464_v49 }
 0x612   :  { %v729_v38 = vadd.f32 %v4643_v57, %v715_v0  ;;  %v1202_v18 = vsel %vm137_vm2, 0.0, %v1186_v33  ;;  %v703_v39 = vmul.f32 %v3281_v40, %v4468_v36  ;;  %v1192_v21 = vpop.permute.xlu0 %1191  ;;  %v4689_v34 = vadd.f32 %v1241_v48, %v5243_v26  ;;  %v4740_v48 = vld [vmem:[%s5127_s4 + $0xa0] sm:$0xff] }
 0x613   :  { %v1242_v11 = vadd.f32 %v1202_v18, %v728_v5  ;;  %1294 = vst [vmem:[%s5129_s6 + $0x28] sm:$0xff] %v730_v4  ;;  %v718_v49 = vmul.f32 %v4640_v43, %v704_v59  ;;  %v1205_v30 = vsel %vm137_vm2, 0.0, %v1192_v21 }
 0x614   :  { %v3283_v55 = vpop.eup %3282  ;;  %1293 = vst [vmem:[%s5129_s6 + $0x20] sm:$0xff] %v729_v38  ;;  %v1243_v36 = vadd.f32 %v1203_v50, %v729_v38  ;;  %v717_v7 = vmul.f32 %v4640_v43, %v703_v39  ;;  %v5250_v39 = vld [vmem:[#allocation38_spill] sm:$0xff]  ;;  %v5251_v50 = vld [vmem:[#allocation37_spill] sm:$0xff] }
 0x615   :  { %v3285_v27 = vpop.eup %3284  ;;  %v1190_v3 = vpop.permute.xlu1 %1189  ;;  %v732_v29 = vadd.f32 %v4643_v57, %v718_v49  ;;  %v706_v32 = vmul.f32 %v3283_v55, %v4477_v58  ;;  %v4704_v37 = vadd.f32 %v5244_v45, %v1242_v11 }
 0x616   :  { %v731_v6 = vadd.f32 %v4643_v57, %v717_v7  ;;  %v1204_v14 = vsel %vm137_vm2, 0.0, %v1190_v3  ;;  %v705_v54 = vmul.f32 %v3285_v27, %v4480_v46  ;;  %v1196_v9 = vpop.permute.xlu0 %1195  ;;  %v4711_v51 = vadd.f32 %v1243_v36, %v5245_v53 }
 0x617   :  { %v1244_v24 = vadd.f32 %v1204_v14, %v730_v4  ;;  %1296 = vst [vmem:[%s5129_s6 + $0x38] sm:$0xff] %v732_v29  ;;  %v720_v58 = vmul.f32 %v4640_v43, %v706_v32  ;;  %v1207_v2 = vsel %vm137_vm2, 0.0, %v1196_v9  ;;  %v5249_v4 = vld [vmem:[#allocation35_spill] sm:$0xff] }
 0x618   :  { %1295 = vst [vmem:[%s5129_s6 + $0x30] sm:$0xff] %v731_v6  ;;  %v1245_v35 = vadd.f32 %v1205_v30, %v731_v6  ;;  %v719_v46 = vmul.f32 %v4640_v43, %v705_v54 }
 0x619   :  { %v1194_v42 = vpop.permute.xlu1 %1193  ;;  %v734_v15 = vadd.f32 %v4643_v57, %v720_v58  ;;  %v4726_v61 = vadd.f32 %v5246_v10, %v1244_v24 }
 0x61a   :  { %v733_v5 = vadd.f32 %v4643_v57, %v719_v46  ;;  %v1206_v41 = vsel %vm137_vm2, 0.0, %v1194_v42  ;;  %v1210_v20 = vpop.permute.xlu0 %1209  ;;  %v4733_v62 = vadd.f32 %v1245_v35, %v5248_v8 }
 0x61b   :  { %v1246_v31 = vadd.f32 %v1206_v41, %v732_v29  ;;  %v1229_v0 = vsel %vm138_vm3, 0.0, %v1210_v20  ;;  %1298 = vst [vmem:[%s5129_s6 + $0x48] sm:$0x1f] %v734_v15 }
 0x61c   :  { %1297 = vst [vmem:[%s5129_s6 + $0x40] sm:$0xff] %v733_v5  ;;  %v1247_v40 = vadd.f32 %v1207_v2, %v733_v5  ;;  %v1259_v1 = vadd.f32 %v1249_v56, %v1229_v0 }
 0x61d   :  { %v1198_v33 = vpop.permute.xlu1 %1197  ;;  %v4751_v59 = vadd.f32 %v5249_v4, %v1246_v31 }
 0x61e   :  { %v1269_v38 = vadd.f32 %v1259_v1, %v4740_v48  ;;  %v1208_v18 = vsel %vm137_vm2, 0.0, %v1198_v33  ;;  %v4757_v21 = vadd.f32 %v1247_v40, %v5250_v39 }
 0x61f   :  { %v1248_v26 = vadd.f32 %v1208_v18, %v734_v15 }
 0x620   :  { %1279 = vst [vmem:[%s5130_s5] sm:$0xff] %v1269_v38 }
 0x621   :  { %v4763_v11 = vadd.f32 %v5251_v50, %v1248_v26 }
 0x64b   :  { %v1750_v49 = vpop.xlane.xlu0 %1749 }
 0x64c   :  { %v1768_v55 = vmul.f32 0.0078125, %v1750_v49 }
 0x64d   :  { %v2995_v36 = vpop.f32.mrb[60].mxu0  ;;  %v4765_v7 = vpop.f32.mrb[50].mxu1 }
 0x64e   :  { %v1778_v27 = vadd.f32 1e-05, %v1768_v55  ;;  %v2023_v22 = vpop.f32.mrb[61].mxu0  ;;  %v1748_v3 = vpop.xlane.xlu1 %1747  ;;  %2174 = vrot.lane.b32.xlu0 %v2995_v36, %s3307_s0 }
 0x64f   :  { %v1767_v29 = vmul.f32 0.0078125, %v1748_v3  ;;  %2172 = vrot.lane.b32.xlu1 %v2023_v22, %s3307_s0  ;;  %v1752_v32 = vpop.xlane.xlu0 %1751  ;;  %v4769_v45 = vpop.f32.mrb[51].mxu1 }
 0x650   :  { %3286 = vrsqrt.f32 %v1778_v27  ;;  %v1769_v6 = vmul.f32 0.0078125, %v1752_v32 }
 0x651   :  { %v1777_v14 = vadd.f32 1e-05, %v1767_v29  ;;  %v3025_v54 = vpop.f32.mrb[52].mxu1  ;;  %v2998_v9 = vpop.f32.mrb[62].mxu0 }
 0x652   :  { %v1779_v53 = vadd.f32 1e-05, %v1769_v6  ;;  %v2123_v30 = vpop.f32.mrb[53].mxu1  ;;  %v1756_v24 = vpop.xlane.xlu1 %1755 }
 0x653   :  { %3288 = vrsqrt.f32 %v1777_v14  ;;  %v1771_v58 = vmul.f32 0.0078125, %v1756_v24  ;;  %v2033_v35 = vpop.f32.mrb[63].mxu0  ;;  %2202 = vrot.lane.b32.xlu0 %v2123_v30, %s3308_s30  ;;  %2178 = vrot.lane.b32.xlu1 %v2998_v9, %s3307_s0  ;;  %v1754_v46 = vpop.xlane.xlu0 %1753 }
 0x654   :  { %3290 = vrsqrt.f32 %v1779_v53  ;;  %v1770_v42 = vmul.f32 0.0078125, %v1754_v46 }
 0x655   :  { %v1781_v15 = vadd.f32 1e-05, %v1771_v58  ;;  %v3001_v10 = vpop.f32.mrb[64].mxu0  ;;  %v3028_v5 = vpop.f32.mrb[54].mxu1 }
 0x656   :  { %v1780_v41 = vadd.f32 1e-05, %v1770_v42  ;;  %v1760_v60 = vpop.xlane.xlu1 %1759  ;;  %v2133_v56 = vpop.f32.mrb[55].mxu1 }
 0x657   :  { %3292 = vrsqrt.f32 %v1781_v15  ;;  %v1773_v20 = vmul.f32 0.0078125, %v1760_v60  ;;  %2182 = vrot.lane.b32.xlu0 %v3001_v10, %s3307_s0  ;;  %2204 = vrot.lane.b32.xlu1 %v3025_v54, %s3308_s30  ;;  %v1758_v8 = vpop.xlane.xlu0 %1757  ;;  %v2043_v2 = vpop.f32.mrb[65].mxu0 }
 0x658   :  { %3294 = vrsqrt.f32 %v1780_v41  ;;  %v1772_v31 = vmul.f32 0.0078125, %v1758_v8 }
 0x659   :  { %v1783_v0 = vadd.f32 1e-05, %v1773_v20  ;;  %v3004_v40 = vpop.f32.mrb[66].mxu0  ;;  %v4775_v1 = vpop.f32.mrb[56].mxu1 }
 0x65a   :  { %v3287_v33 = vpop.eup %3286  ;;  %v1782_v4 = vadd.f32 1e-05, %v1772_v31  ;;  %v1764_v38 = vpop.xlane.xlu1 %1763 }
 0x65b   :  { %v2143_v18 = vpop.f32.mrb[57].mxu1  ;;  %3296 = vrsqrt.f32 %v1783_v0  ;;  %v1775_v39 = vmul.f32 0.0078125, %v1764_v38  ;;  %2206 = vrot.lane.b32.xlu0 %v2133_v56, %s3308_s30  ;;  %2176 = vrot.lane.b32.xlu1 %v2033_v35, %s3307_s0  ;;  %v1762_v26 = vpop.xlane.xlu0 %1761  ;;  %v1798_v49 = vmul.f32 %v3287_v33, %v4565_v13  ;;  %v4791_v13 = vld [vmem:[%s5127_s4 + $0xa8] sm:$0xff]  ;;  %v4824_v0 = vld [vmem:[%s5127_s4 + $0xb8] sm:$0xff] }
 0x65c   :  { %v4779_v50 = vpop.f32.mrb[67].mxu0  ;;  %3298 = vrsqrt.f32 %v1782_v4  ;;  %v1774_v55 = vmul.f32 0.0078125, %v1762_v26 }
 0x65d   :  { %v3289_v36 = vpop.eup %3288  ;;  %v1785_v27 = vadd.f32 1e-05, %v1775_v39  ;;  %v3007_v22 = vpop.f32.mrb[68].mxu0  ;;  %v1808_v29 = vmul.f32 %v1798_v49, %v4640_v43 }
 0x65e   :  { %v4782_v3 = vpop.f32.mrb[58].mxu1  ;;  %v3291_v32 = vpop.eup %3290  ;;  %v1784_v6 = vadd.f32 1e-05, %v1774_v55  ;;  %v1797_v9 = vmul.f32 %v3289_v36, %v4568_v25 }
 0x65f   :  { %v1212_v14 = vpop.permute.xlu1 %1211  ;;  %v4785_v54 = vpop.f32.mrb[59].mxu1  ;;  %3300 = vrsqrt.f32 %v1785_v27  ;;  %2186 = vrot.lane.b32.xlu0 %v3004_v40, %s3307_s0  ;;  %2208 = vrot.lane.b32.xlu1 %v3028_v5, %s3308_s30  ;;  %v4800_v58 = vadd.f32 %v1808_v29, %v4643_v57  ;;  %v1799_v25 = vmul.f32 %v3291_v32, %v4571_v17 }
 0x660   :  { %v1230_v53 = vsel %vm138_vm3, 0.0, %v1212_v14  ;;  %v1766_v30 = vpop.xlane.xlu0 %1765  ;;  %v4797_v24 = vpop.f32.mrb[69].mxu0  ;;  %3302 = vrsqrt.f32 %v1784_v6  ;;  %v1807_v42 = vmul.f32 %v1797_v9, %v4640_v43  ;;  %v4871_v9 = vld [vmem:[%s5127_s4 + $0xc8] sm:$0xff] }
 0x661   :  { %v1260_v35 = vadd.f32 %v4666_v52, %v1230_v53  ;;  %v1776_v46 = vmul.f32 0.0078125, %v1766_v30  ;;  %v3293_v15 = vpop.eup %3292  ;;  %v4805_v10 = vpop.f32.mrb[60].mxu1  ;;  %2415 = vst [vmem:[%s5129_s6 + $0x58] sm:$0xff] %v4800_v58  ;;  %v1809_v41 = vmul.f32 %v1799_v25, %v4640_v43 }
 0x662   :  { %v4811_v5 = vpop.f32.mrb[70].mxu0  ;;  %v3295_v60 = vpop.eup %3294  ;;  %v4818_v8 = vadd.f32 %v1807_v42, %v4643_v57  ;;  %v1801_v31 = vmul.f32 %v3293_v15, %v4576_v63 }
 0x663   :  { %v1270_v17 = vadd.f32 %v1260_v35, %v4791_v13  ;;  %v1786_v56 = vadd.f32 1e-05, %v1776_v46  ;;  %v1216_v52 = vpop.permute.xlu1 %1215  ;;  %v4815_v20 = vpop.f32.mrb[61].mxu1  ;;  %2210 = vrot.lane.b32.xlu0 %v2143_v18, %s3308_s30  ;;  %2180 = vrot.lane.b32.xlu1 %v2043_v2, %s3307_s0  ;;  %v1800_v38 = vmul.f32 %v3295_v60, %v4581_v47  ;;  %v4834_v39 = vadd.f32 %v1809_v41, %v4643_v57  ;;  %v4843_v18 = vld [vmem:[%s5127_s4 + $0xb0] sm:$0xff]  ;;  %v4889_v46 = vld [vmem:[%s5127_s4 + $0xc0] sm:$0xff] }
 0x664   :  { %v1232_v40 = vsel %vm138_vm3, 0.0, %v1216_v52  ;;  %v1214_v33 = vpop.permute.xlu0 %1213  ;;  %v4830_v4 = vpop.f32.mrb[71].mxu0  ;;  %2414 = vst [vmem:[%s5129_s6 + $0x50] sm:$0xff] %v4818_v8  ;;  %v1811_v47 = vmul.f32 %v1801_v31, %v4640_v43 }
 0x665   :  { %1280 = vst [vmem:[%s5130_s5 + $0x8] sm:$0xff] %v1270_v17  ;;  %3304 = vrsqrt.f32 %v1786_v56  ;;  %v1262_v63 = vadd.f32 %v4704_v37, %v1232_v40  ;;  %v1231_v2 = vsel %vm138_vm3, 0.0, %v1214_v33  ;;  %v3297_v26 = vpop.eup %3296  ;;  %v1810_v37 = vmul.f32 %v1800_v38, %v4640_v43  ;;  %v4854_v55 = vpop.f32.mrb[72].mxu0  ;;  %2416 = vst [vmem:[%s5129_s6 + $0x60] sm:$0xff] %v4834_v39  ;;  %v4920_v40 = vld [vmem:[%s5127_s4 + $0xd8] sm:$0xff] }
 0x666   :  { %v1261_v49 = vadd.f32 %v4689_v34, %v1231_v2  ;;  %v3299_v36 = vpop.eup %3298  ;;  %v4861_v32 = vpop.f32.mrb[73].mxu0  ;;  %v4864_v6 = vadd.f32 %v1811_v47, %v4643_v57  ;;  %v1803_v34 = vmul.f32 %v3297_v26, %v4586_v19  ;;  %v4939_v47 = vld [vmem:[%s5127_s4 + $0xd0] sm:$0xff] }
 0x667   :  { %v1272_v27 = vadd.f32 %v1262_v63, %v4824_v0  ;;  %v1220_v29 = vpop.permute.xlu1 %1219  ;;  %2190 = vrot.lane.b32.xlu0 %v3007_v22, %s3307_s0  ;;  %2212 = vrot.lane.b32.xlu1 %v4775_v1, %s3308_s30  ;;  %v4879_v25 = vadd.f32 %v1810_v37, %v4643_v57  ;;  %v1802_v19 = vmul.f32 %v3299_v36, %v4591_v44 }
 0x668   :  { %v1271_v14 = vadd.f32 %v1261_v49, %v4843_v18  ;;  %v1234_v53 = vsel %vm138_vm3, 0.0, %v1220_v29  ;;  %v1218_v30 = vpop.permute.xlu0 %1217  ;;  %2418 = vst [vmem:[%s5129_s6 + $0x70] sm:$0xff] %v4864_v6  ;;  %v1813_v44 = vmul.f32 %v1803_v34, %v4640_v43  ;;  %v4969_v34 = vld [vmem:[%s5127_s4 + $0xe8] sm:$0xff] }
 0x669   :  { %1282 = vst [vmem:[%s5130_s5 + $0x18] sm:$0xff] %v1272_v27  ;;  %v1264_v35 = vadd.f32 %v4726_v61, %v1234_v53  ;;  %v1233_v1 = vsel %vm138_vm3, 0.0, %v1218_v30  ;;  %v3301_v22 = vpop.eup %3300  ;;  %2417 = vst [vmem:[%s5129_s6 + $0x68] sm:$0xff] %v4879_v25  ;;  %v1812_v42 = vmul.f32 %v1802_v19, %v4640_v43  ;;  %v4907_v15 = vpop.f32.mrb[74].mxu0 }
 0x66a   :  { %1281 = vst [vmem:[%s5130_s5 + $0x10] sm:$0xff] %v1271_v14  ;;  %v1263_v61 = vadd.f32 %v4711_v51, %v1233_v1  ;;  %v3303_v41 = vpop.eup %3302  ;;  %v4910_v56 = vpop.f32.mrb[75].mxu0  ;;  %v4913_v52 = vadd.f32 %v1813_v44, %v4643_v57  ;;  %v1805_v51 = vmul.f32 %v3301_v22, %v4596_v28  ;;  %v4988_v1 = vld [vmem:[%s5127_s4 + $0xe0] sm:$0xff] }
 0x66b   :  { %v1274_v60 = vadd.f32 %v1264_v35, %v4871_v9  ;;  %v1224_v17 = vpop.permute.xlu1 %1223  ;;  %2184 = vrot.lane.b32.xlu1 %v4779_v50, %s3307_s0  ;;  %2214 = vrot.lane.b32.xlu0 %v4785_v54, %s3308_s30  ;;  %v4929_v63 = vadd.f32 %v1812_v42, %v4643_v57  ;;  %v1804_v28 = vmul.f32 %v3303_v41, %v4601_v12 }
 0x66c   :  { %v1273_v31 = vadd.f32 %v1263_v61, %v4889_v46  ;;  %v1236_v33 = vsel %vm138_vm3, 0.0, %v1224_v17  ;;  %v1222_v38 = vpop.permute.xlu0 %1221  ;;  %2420 = vst [vmem:[%s5129_s6 + $0x80] sm:$0xff] %v4913_v52  ;;  %v1815_v12 = vmul.f32 %v1805_v51, %v4640_v43 }
 0x66d   :  { %1284 = vst [vmem:[%s5130_s5 + $0x28] sm:$0xff] %v1274_v60  ;;  %v1266_v2 = vadd.f32 %v4751_v59, %v1236_v33  ;;  %v1235_v50 = vsel %vm138_vm3, 0.0, %v1222_v38  ;;  %2419 = vst [vmem:[%s5129_s6 + $0x78] sm:$0xff] %v4929_v63  ;;  %v1814_v54 = vmul.f32 %v1804_v28, %v4640_v43  ;;  %v4957_v26 = vpop.f32.mrb[76].mxu0 }
 0x66e   :  { %1283 = vst [vmem:[%s5130_s5 + $0x20] sm:$0xff] %v1273_v31  ;;  %v1265_v59 = vadd.f32 %v4733_v62, %v1235_v50  ;;  %v4960_v27 = vpop.f32.mrb[77].mxu0  ;;  %v4963_v29 = vadd.f32 %v1815_v12, %v4643_v57 }
 0x66f   :  { %v3305_v49 = vpop.eup %3304  ;;  %v1276_v37 = vadd.f32 %v1266_v2, %v4920_v40  ;;  %v1228_v36 = vpop.permute.xlu1 %1227  ;;  %2216 = vrot.lane.b32.xlu1 %v4782_v3, %s3308_s30  ;;  %2218 = vrot.lane.b32.xlu0 %v4815_v20, %s3308_s30  ;;  %v4978_v30 = vadd.f32 %v1814_v54, %v4643_v57 }
 0x670   :  { %v1275_v62 = vadd.f32 %v1265_v59, %v4939_v47  ;;  %v1238_v14 = vsel %vm138_vm3, 0.0, %v1228_v36  ;;  %v1226_v53 = vpop.permute.xlu0 %1225  ;;  %v1806_v19 = vmul.f32 %v3305_v49, %v4608_v23  ;;  %2422 = vst [vmem:[%s5129_s6 + $0x90] sm:$0xff] %v4963_v29 }
 0x671   :  { %1286 = vst [vmem:[%s5130_s5 + $0x38] sm:$0xff] %v1276_v37  ;;  %v1268_v35 = vadd.f32 %v4763_v11, %v1238_v14  ;;  %v1237_v3 = vsel %vm138_vm3, 0.0, %v1226_v53  ;;  %2421 = vst [vmem:[%s5129_s6 + $0x88] sm:$0xff] %v4978_v30 }
 0x672   :  { %1285 = vst [vmem:[%s5130_s5 + $0x30] sm:$0xff] %v1275_v62  ;;  %v1267_v23 = vadd.f32 %v4757_v21, %v1237_v3  ;;  %v1816_v11 = vmul.f32 %v1806_v19, %v4640_v43 }
 0x673   :  { %v1278_v20 = vadd.f32 %v1268_v35, %v4969_v34  ;;  %2188 = vrot.lane.b32.xlu1 %v4797_v24, %s3307_s0 }
 0x674   :  { %v1277_v44 = vadd.f32 %v1267_v23, %v4988_v1  ;;  %v5010_v22 = vadd.f32 %v1816_v11, %v4643_v57 }
 0x675   :  { %1288 = vst [vmem:[%s5130_s5 + $0x48] sm:$0x1f] %v1278_v20 }
 0x676   :  { %1287 = vst [vmem:[%s5130_s5 + $0x40] sm:$0xff] %v1277_v44  ;;  %2423 = vst [vmem:[%s5129_s6 + $0x98] sm:$0x1f] %v5010_v22 }
 0x677   :  { %2220 = vrot.lane.b32.xlu1 %v4805_v10, %s3308_s30 }
 0x6c0   :  { %v2175_v43 = vpop.permute.xlu0 %2174 }
 0x6c1   :  { %v2173_v21 = vpop.permute.xlu1 %2172  ;;  %v2193_v57 = vsel %vm137_vm2, 0.0, %v2175_v43 }
 0x6c2   :  { %v2192_v24 = vsel %vm137_vm2, 0.0, %v2173_v21  ;;  %v2233_v42 = vadd.f32 %v2193_v57, %v4800_v58 }
 0x6c3   :  { %v2232_v61 = vadd.f32 %v2192_v24, %v4818_v8 }
 0x6c4   :  { %v2243_v31 = vadd.f32 %v4811_v5, %v2233_v42 }
 0x6c5   :  { %v2242_v41 = vadd.f32 %v2232_v61, %v4830_v4  ;;  %v2179_v60 = vpop.permute.xlu1 %2178  ;;  %v2203_v17 = vpop.permute.xlu0 %2202 }
 0x6c6   :  { %v2222_v51 = vsel %vm138_vm3, 0.0, %v2203_v17  ;;  %v2195_v2 = vsel %vm137_vm2, 0.0, %v2179_v60 }
 0x6c7   :  { %v2252_v10 = vadd.f32 %v2242_v41, %v2222_v51  ;;  %v2235_v4 = vadd.f32 %v2195_v2, %v4879_v25 }
 0x6c9   :  { %v2262_v33 = vadd.f32 %v2252_v10, %v4740_v48  ;;  %v2205_v38 = vpop.permute.xlu1 %2204  ;;  %v2183_v28 = vpop.permute.xlu0 %2182  ;;  %v2245_v49 = vadd.f32 %v4854_v55, %v2235_v4 }
 0x6ca   :  { %v2223_v58 = vsel %vm138_vm3, 0.0, %v2205_v38  ;;  %v2197_v36 = vsel %vm137_vm2, 0.0, %v2183_v28 }
 0x6cb   :  { %2404 = vst [vmem:[%s5130_s5 + $0x50] sm:$0xff] %v2262_v33  ;;  %v2253_v8 = vadd.f32 %v2243_v31, %v2223_v58  ;;  %v2237_v19 = vadd.f32 %v2197_v36, %v4929_v63 }
 0x6cd   :  { %v2263_v50 = vadd.f32 %v2253_v8, %v4791_v13  ;;  %v2177_v5 = vpop.permute.xlu1 %2176  ;;  %v2207_v12 = vpop.permute.xlu0 %2206 }
 0x6ce   :  { %v2194_v48 = vsel %vm137_vm2, 0.0, %v2177_v5  ;;  %v2224_v54 = vsel %vm138_vm3, 0.0, %v2207_v12 }
 0x6cf   :  { %2405 = vst [vmem:[%s5130_s5 + $0x58] sm:$0xff] %v2263_v50  ;;  %v2234_v59 = vadd.f32 %v2194_v48, %v4834_v39 }
 0x6d1   :  { %v2244_v25 = vadd.f32 %v2234_v59, %v4861_v32  ;;  %v2209_v37 = vpop.permute.xlu1 %2208  ;;  %v2187_v13 = vpop.permute.xlu0 %2186 }
 0x6d2   :  { %v2225_v62 = vsel %vm138_vm3, 0.0, %v2209_v37  ;;  %v2199_v44 = vsel %vm137_vm2, 0.0, %v2187_v13 }
 0x6d3   :  { %v2254_v14 = vadd.f32 %v2244_v25, %v2224_v54  ;;  %v2255_v53 = vadd.f32 %v2245_v49, %v2225_v62  ;;  %v2239_v24 = vadd.f32 %v2199_v44, %v4978_v30 }
 0x6d5   :  { %v2264_v39 = vadd.f32 %v2254_v14, %v4843_v18  ;;  %v2265_v35 = vadd.f32 %v2255_v53, %v4824_v0  ;;  %v2181_v3 = vpop.permute.xlu1 %2180  ;;  %v2211_v55 = vpop.permute.xlu0 %2210  ;;  %v2247_v0 = vadd.f32 %v4907_v15, %v2237_v19 }
 0x6d6   :  { %v2196_v32 = vsel %vm137_vm2, 0.0, %v2181_v3  ;;  %v2226_v18 = vsel %vm138_vm3, 0.0, %v2211_v55 }
 0x6d7   :  { %2406 = vst [vmem:[%s5130_s5 + $0x60] sm:$0xff] %v2264_v39  ;;  %2407 = vst [vmem:[%s5130_s5 + $0x68] sm:$0xff] %v2265_v35  ;;  %v2236_v23 = vadd.f32 %v2196_v32, %v4864_v6 }
 0x6d9   :  { %v2246_v63 = vadd.f32 %v2236_v23, %v4910_v56  ;;  %v2213_v11 = vpop.permute.xlu1 %2212  ;;  %v2191_v20 = vpop.permute.xlu0 %2190 }
 0x6da   :  { %v2227_v43 = vsel %vm138_vm3, 0.0, %v2213_v11  ;;  %v2201_v17 = vsel %vm137_vm2, 0.0, %v2191_v20 }
 0x6db   :  { %v2256_v21 = vadd.f32 %v2246_v63, %v2226_v18  ;;  %v2257_v57 = vadd.f32 %v2247_v0, %v2227_v43  ;;  %v2241_v33 = vadd.f32 %v2201_v17, %v5010_v22 }
 0x6dd   :  { %v2266_v6 = vadd.f32 %v2256_v21, %v4889_v46  ;;  %v2267_v61 = vadd.f32 %v2257_v57, %v4871_v9  ;;  %v2185_v42 = vpop.permute.xlu1 %2184  ;;  %v2215_v15 = vpop.permute.xlu0 %2214  ;;  %v2249_v9 = vadd.f32 %v4957_v26, %v2239_v24 }
 0x6de   :  { %v2198_v56 = vsel %vm137_vm2, 0.0, %v2185_v42  ;;  %v2228_v46 = vsel %vm138_vm3, 0.0, %v2215_v15 }
 0x6df   :  { %2408 = vst [vmem:[%s5130_s5 + $0x70] sm:$0xff] %v2266_v6  ;;  %2409 = vst [vmem:[%s5130_s5 + $0x78] sm:$0xff] %v2267_v61  ;;  %v2238_v41 = vadd.f32 %v2198_v56, %v4913_v52 }
 0x6e1   :  { %v2248_v30 = vadd.f32 %v2238_v41, %v4960_v27  ;;  %v2217_v60 = vpop.permute.xlu1 %2216  ;;  %v2219_v2 = vpop.permute.xlu0 %2218 }
 0x6e2   :  { %v2229_v51 = vsel %vm138_vm3, 0.0, %v2217_v60 }
 0x6e3   :  { %v2259_v10 = vadd.f32 %v2249_v9, %v2229_v51  ;;  %v2258_v31 = vadd.f32 %v2248_v30, %v2228_v46 }
 0x6e5   :  { %v2269_v52 = vadd.f32 %v2259_v10, %v4920_v40  ;;  %v2268_v38 = vadd.f32 %v2258_v31, %v4939_v47  ;;  %v2189_v28 = vpop.permute.xlu1 %2188  ;;  %v2230_v40 = vsel %vm138_vm3, 0.0, %v2219_v2  ;;  %v2251_v47 = vadd.f32 %v4765_v7, %v2241_v33 }
 0x6e6   :  { %v2200_v26 = vsel %vm137_vm2, 0.0, %v2189_v28 }
 0x6e7   :  { %2411 = vst [vmem:[%s5130_s5 + $0x88] sm:$0xff] %v2269_v52  ;;  %2410 = vst [vmem:[%s5130_s5 + $0x80] sm:$0xff] %v2268_v38  ;;  %v2240_v27 = vadd.f32 %v2200_v26, %v4963_v29 }
 0x6e9   :  { %v2221_v22 = vpop.permute.xlu1 %2220  ;;  %v2250_v58 = vadd.f32 %v2240_v27, %v4769_v45 }
 0x6ea   :  { %v2231_v8 = vsel %vm138_vm3, 0.0, %v2221_v22 }
 0x6eb   :  { %v2261_v4 = vadd.f32 %v2251_v47, %v2231_v8  ;;  %v2260_v50 = vadd.f32 %v2250_v58, %v2230_v40 }
 0x6ed   :  { %v2271_v5 = vadd.f32 %v2261_v4, %v4969_v34  ;;  %v2270_v12 = vadd.f32 %v2260_v50, %v4988_v1 }
 0x6ef   :  { %2413 = vst [vmem:[%s5130_s5 + $0x98] sm:$0x1f] %v2271_v5  ;;  %2412 = vst [vmem:[%s5130_s5 + $0x90] sm:$0xff] %v2270_v12 }

</bundles_post_ra>
